<compile_context>
chip_gen: v7x
topology: tpu7x:2x2x1
jax: 0.10.0
libtpu: 0.0.40
codegen_flags: <defaults>
</compile_context>

<pallas_src>
from functools import partial

import jax
import jax.numpy as jnp
from jax.experimental import pallas as pl
from jax.experimental.pallas import tpu as pltpu

_SEG = 128  # every M_all transform segment starts at a multiple of this (lane tile)


# ----------------------------------------------------------------------------- kernel
def _refiner_kernel(x_ref, m_ref, cinv_ref, w1_ref, w2_ref, wl_ref, bvec_ref,
                    o_ref, *, L_rm):
    B, L = x_ref.shape
    H = o_ref.shape[1]
    S = _SEG

    x = x_ref[...]                                             # (B, L) f32

    # ONE matmul -> every linear series transform + both DFTs (lane-aligned segments)
    t = jnp.dot(x, m_ref[...], preferred_element_type=jnp.float32)
    x_cs  = t[:, 0 * S:0 * S + L]                              # cumulative sum
    x_dif = t[:, 1 * S:1 * S + L]                              # diff (zero prepended)
    x_dfm = t[:, 2 * S:2 * S + L]                              # detrended cum. deviation
    re    = t[:, 3 * S:3 * S + L]                              # L-point DFT (real)
    im    = t[:, 4 * S:4 * S + L]                              # L-point DFT (imag)
    re2   = t[:, 5 * S:5 * S + 2 * L]                          # 2L-point DFT of pad(x)
    im2   = t[:, 6 * S:6 * S + 2 * L]
    x_rm  = t[:, 7 * S:7 * S + L_rm]                           # rolling mean

    x_fft = jnp.sqrt(re * re + im * im)                        # |FFT_L(x)|
    power = re2 * re2 + im2 * im2                              # |FFT_2L(pad(x))|^2
    # non-negative-lag autocorrelation via Wiener-Khinchin (exact for zero padding)
    x_acr = jnp.dot(power, cinv_ref[...], preferred_element_type=jnp.float32)

    def norm(v):
        # LayerNorm core (torch eps=1e-5, biased variance); affine folded into W1
        mu = jnp.mean(v, axis=-1, keepdims=True)
        c = v - mu
        var = jnp.mean(c * c, axis=-1, keepdims=True)
        return c * jax.lax.rsqrt(var + 1e-5)

    # Concatenated branch inputs feeding the block-diagonal stage-1 weight.
    pieces = [norm(x), norm(x_cs), norm(x_dif), norm(x_dfm),
              norm(x_fft), norm(x_acr), norm(x_rm)]
    pad = w1_ref.shape[0] - (6 * L + L_rm)
    if pad:
        pieces.append(jnp.zeros((B, pad), jnp.float32))
    cat = jnp.concatenate(pieces, axis=-1).astype(jnp.bfloat16)

    b1 = bvec_ref[0:1, 0:w1_ref.shape[1]]
    b2 = bvec_ref[1:2, 0:w2_ref.shape[1]]

    # 3 MXU matmuls for all 7 branches (conv1 / conv2 / Linear+lin_out fold)
    h1 = jnp.maximum(
        jnp.dot(cat, w1_ref[...], preferred_element_type=jnp.float32) + b1, 0.0)
    h2 = jnp.maximum(
        jnp.dot(h1.astype(jnp.bfloat16), w2_ref[...],
                preferred_element_type=jnp.float32) + b2, 0.0)
    out = jnp.dot(h2.astype(jnp.bfloat16), wl_ref[...],
                  preferred_element_type=jnp.float32)
    o_ref[...] = out + bvec_ref[2:3, 0:H]                      # folded biases + lin_out.b


# ----------------------------------------------------------------------------- wrapper
@partial(jax.jit, static_argnames=("rm_window",))
def refiner_forward(x, fused, *, rm_window):
    """x: (B, 1, L) NCW float32 (channels == 1). Returns (B, 1, H)."""
    B, _, L = x.shape
    L_rm = L - rm_window + 1
    H = fused['Wl'].shape[1]
    args = (x[:, 0, :], fused['M_all'], fused['Cinv'],
            fused['W1'], fused['W2'], fused['Wl'], fused['bvec'])
    out = pl.pallas_call(
        partial(_refiner_kernel, L_rm=L_rm),
        out_shape=jax.ShapeDtypeStruct((B, H), jnp.float32),
        in_specs=[pl.BlockSpec(memory_space=pltpu.MemorySpace.VMEM) for _ in args],
        out_specs=pl.BlockSpec(memory_space=pltpu.MemorySpace.VMEM),
    )(*args)
    return out.reshape(B, 1, H)


# ----------------------------------------------------------------------------- host-side param folding
def _conv1_toeplitz(w1, L):
    """Conv1d(1->F, k) as (L, F*L1) weight; output channel-major [f*L1 + t]."""
    F, k = w1.shape
    L1 = L - k + 1
    i = jnp.arange(L)[:, None, None]
    f = jnp.arange(F)[None, :, None]
    t = jnp.arange(L1)[None, None, :]
    j = i - t
    valid = (j >= 0) & (j < k)
    vals = jnp.where(valid, w1[f, jnp.clip(j, 0, k - 1)], 0.0)
    return vals.reshape(L, F * L1)


def _conv2_toeplitz(w2, L1):
    """Conv1d(F->F, k) on channel-major input as (F*L1, F*L2) block-Toeplitz weight."""
    Fo, Fi, k = w2.shape
    L2 = L1 - k + 1
    fi = jnp.arange(Fi)[:, None, None, None]
    s = jnp.arange(L1)[None, :, None, None]
    fo = jnp.arange(Fo)[None, None, :, None]
    t = jnp.arange(L2)[None, None, None, :]
    j = s - t
    valid = (j >= 0) & (j < k)
    vals = jnp.where(valid, w2[fo, fi, jnp.clip(j, 0, k - 1)], 0.0)
    return vals.reshape(Fi * L1, Fo * L2)


def _transform_matrices(L, L_rm, rm_window, seg=_SEG):
    """All linear series transforms + DFTs, each segment padded to a 128-lane slot."""
    f32 = jnp.float32
    idx = jnp.arange(L)
    # cumulative sum
    T_cs = (idx[:, None] <= idx[None, :]).astype(f32)
    # diff with zero prepended
    T_diff = jnp.eye(L, dtype=f32) - jnp.eye(L, k=1, dtype=f32)
    # devfm (exact closed form; coefficient of x_0 is identically zero)
    lin = jnp.linspace(0.0, 1.0, L, dtype=f32)
    T_dfm = (idx[:, None] <= idx[None, :]).astype(f32) - lin[None, :]
    T_dfm = jnp.where(idx[:, None] == 0, 0.0, T_dfm)
    # L-point DFT (for |FFT(x)|)
    n = idx.astype(f32)
    ang = 2.0 * jnp.pi * n[:, None] * n[None, :] / L
    C, Sm = jnp.cos(ang), -jnp.sin(ang)
    # 2L-point DFT of zero-padded series (power spectrum for exact linear autocorr)
    N = 2 * L
    k2 = jnp.arange(N, dtype=f32)
    ang2 = 2.0 * jnp.pi * n[:, None] * k2[None, :] / N
    C2, S2 = jnp.cos(ang2), -jnp.sin(ang2)
    m = jnp.arange(L, dtype=f32)
    Cinv = jnp.cos(2.0 * jnp.pi * k2[:, None] * m[None, :] / N) / N     # (2L, L)
    # rolling mean (window rm_window, step 1)
    jr = jnp.arange(L_rm)
    T_rm = ((idx[:, None] >= jr[None, :]) &
            (idx[:, None] < jr[None, :] + rm_window)).astype(f32) / rm_window

    def pad_seg(T):
        return jnp.pad(T, ((0, 0), (0, seg - T.shape[1])))

    M_all = jnp.concatenate(
        [pad_seg(T) for T in (T_cs, T_diff, T_dfm, C, Sm, C2, S2, T_rm)], axis=1)
    return M_all, Cinv


def init_refiner_params(key, L, H, F, k, rm_window):
    """Random parameters in the original (PyTorch-like) layout."""
    names = ('seq', 'cs', 'diff', 'devfm', 'fft', 'rm', 'acor')   # lin_out cat order
    keys = jax.random.split(key, len(names) + 1)
    L_rm = L - rm_window + 1

    def block(bk, Lb):
        ks = jax.random.split(bk, 8)
        L2 = (Lb - k + 1) - k + 1
        return dict(
            ln_w=1.0 + 0.1 * jax.random.normal(ks[6], (Lb,), jnp.float32),
            ln_b=0.1 * jax.random.normal(ks[7], (Lb,), jnp.float32),
            w1=0.1 * jax.random.normal(ks[0], (F, k), jnp.float32),      # Conv1d(1->F)
            b1=0.1 * jax.random.normal(ks[1], (F,), jnp.float32),
            w2=0.1 * jax.random.normal(ks[2], (F, F, k), jnp.float32),   # Conv1d(F->F)
            b2=0.1 * jax.random.normal(ks[3], (F,), jnp.float32),
            wl=0.1 * jax.random.normal(ks[4], (F * L2, H), jnp.float32), # Linear (transposed)
            bl=0.1 * jax.random.normal(ks[5], (H,), jnp.float32),
        )

    params = {n: block(kk, L_rm if n == 'rm' else L)
              for n, kk in zip(names, keys[:-1])}
    ko1, ko2 = jax.random.split(keys[-1])
    params['out_wT'] = 0.1 * jax.random.normal(ko1, (H * len(names), H), jnp.float32)
    params['out_b'] = 0.1 * jax.random.normal(ko2, (1, H), jnp.float32)
    params['names'] = names
    return params


def fuse_params(params, L, H, F, k, rm_window):
    """Fold LN-affine + convs + lin_out into block-diagonal matmul weights."""
    names = params['names']
    L_rm = L - rm_window + 1
    M_all, Cinv = _transform_matrices(L, L_rm, rm_window)
    hp = jax.lax.Precision.HIGHEST                 # host-side folds stay f32-exact

    def fold(raw, Lb, slot):
        L1 = Lb - k + 1
        L2 = L1 - k + 1
        Wo = params['out_wT'][slot * H:(slot + 1) * H, :]             # (H, H) lin_out slice
        W1t = _conv1_toeplitz(raw['w1'], Lb)                          # (Lb, F*L1)
        W1f = raw['ln_w'][:, None] * W1t                              # LN scale folded
        b1f = jnp.dot(raw['ln_b'], W1t, precision=hp) + jnp.repeat(raw['b1'], L1)
        W2t = _conv2_toeplitz(raw['w2'], L1)                          # (F*L1, F*L2)
        b2f = jnp.repeat(raw['b2'], L2)
        Wlf = jnp.dot(raw['wl'], Wo, precision=hp)                    # (F*L2, H)
        bf = jnp.dot(raw['bl'], Wo, precision=hp)                     # (H,)
        return W1f, b1f, W2t, b2f, Wlf, bf

    order = ('seq', 'cs', 'diff', 'devfm', 'fft', 'acor', 'rm')       # kernel branch order
    lens = (L, L, L, L, L, L, L_rm)
    folded = [fold(params[n], lb, names.index(n)) for n, lb in zip(order, lens)]

    K1 = pl.cdiv(sum(lens), 8) * 8                                    # 103 -> 104
    N1 = sum(f[0].shape[1] for f in folded)                           # 768
    N2 = pl.cdiv(sum(f[2].shape[1] for f in folded), 128) * 128       # 712 -> 768

    W1_blk = jnp.zeros((K1, N1), jnp.float32)
    W2_blk = jnp.zeros((N1, N2), jnp.float32)
    Wl_cat = jnp.zeros((N2, H), jnp.float32)
    b1_cat = jnp.zeros((N1,), jnp.float32)
    b2_cat = jnp.zeros((N2,), jnp.float32)
    bias = params['out_b'][0]
    r = c1 = c2 = 0
    for (W1f, b1f, W2t, b2f, Wlf, bf), lb in zip(folded, lens):
        n1, n2 = W1f.shape[1], W2t.shape[1]
        W1_blk = W1_blk.at[r:r + lb, c1:c1 + n1].set(W1f)
        b1_cat = b1_cat.at[c1:c1 + n1].set(b1f)
        W2_blk = W2_blk.at[c1:c1 + n1, c2:c2 + n2].set(W2t)
        b2_cat = b2_cat.at[c2:c2 + n2].set(b2f)
        Wl_cat = Wl_cat.at[c2:c2 + n2, :].set(Wlf)
        bias = bias + bf
        r, c1, c2 = r + lb, c1 + n1, c2 + n2

    bvec = jnp.zeros((3, max(N1, N2)), jnp.float32)
    bvec = bvec.at[0, :N1].set(b1_cat)
    bvec = bvec.at[1, :N2].set(b2_cat)
    bvec = bvec.at[2, :H].set(bias)

    return dict(M_all=M_all, Cinv=Cinv,
                W1=W1_blk.astype(jnp.bfloat16),
                W2=W2_blk.astype(jnp.bfloat16),
                Wl=Wl_cat.astype(jnp.bfloat16),
                bvec=bvec)


# ----------------------------------------------------------------------------- pure-JAX reference
def refiner_reference(x, params, rm_window):
    """Op-by-op mirror of the PyTorch graph, from the raw (unfolded) parameters."""
    B, _, L = x.shape
    x2 = x[:, 0, :]
    names = params['names']

    def conv_block(xt, raw):
        Lb = xt.shape[1]
        mu = xt.mean(-1, keepdims=True)
        var = ((xt - mu) ** 2).mean(-1, keepdims=True)
        xn = (xt - mu) / jnp.sqrt(var + 1e-5) * raw['ln_w'] + raw['ln_b']
        F_, k = raw['w1'].shape
        L1 = Lb - k + 1
        h1 = jnp.stack(
            [sum(xn[:, j:j + L1] * raw['w1'][f, j] for j in range(k)) + raw['b1'][f]
             for f in range(F_)], axis=1)
        h1 = jnp.maximum(h1, 0.0)
        L2 = L1 - k + 1
        h2 = jnp.stack(
            [sum(h1[:, fi, j:j + L2] * raw['w2'][fo, fi, j]
                 for fi in range(F_) for j in range(k)) + raw['b2'][fo]
             for fo in range(F_)], axis=1)
        h2 = jnp.maximum(h2, 0.0)
        return h2.reshape(B, -1) @ raw['wl'] + raw['bl']

    lin = jnp.linspace(0.0, 1.0, L, dtype=x2.dtype)
    c = jnp.cumsum(x2 - x2[:, :1], axis=-1)
    feats = {
        'seq': x2,
        'cs': jnp.cumsum(x2, axis=-1),
        'diff': x2 - jnp.concatenate([jnp.zeros((B, 1), x2.dtype), x2[:, :-1]], -1),
        'devfm': c - c[:, -1:] * lin[None, :],
        'fft': jnp.abs(jnp.fft.fft(x2)).astype(jnp.float32),
        'rm': jnp.stack([x2[:, j:j + rm_window].mean(-1)
                         for j in range(L - rm_window + 1)], axis=-1),
        'acor': jnp.stack([jnp.sum(x2[:, :L - lag] * x2[:, lag:], axis=-1)
                           for lag in range(L)], axis=-1),
    }
    cat = jnp.concatenate([conv_block(feats[n], params[n]) for n in names], axis=-1)
    out = cat @ params['out_wT'] + params['out_b']
    return out.reshape(B, 1, -1)


# ----------------------------------------------------------------------------- main
if __name__ == "__main__":
    B, L_in, horizon = 2, 16, 8
    filters, kernel_sz, rm_window = 8, 2, 10

    key = jax.random.PRNGKey(0)
    kx, kp = jax.random.split(key)
    x = jax.random.normal(kx, (B, 1, L_in), jnp.float32)

    params = init_refiner_params(kp, L_in, horizon, filters, kernel_sz, rm_window)
    fused = fuse_params(params, L_in, horizon, filters, kernel_sz, rm_window)

    out = jax.block_until_ready(refiner_forward(x, fused, rm_window=rm_window))
    assert out.shape == (B, 1, horizon), out.shape

    ref = jax.block_until_ready(refiner_reference(x, params, rm_window))
    # bf16-input (single-pass MXU) matmuls in kernel and reference -> relaxed tolerance
    max_err = float(jnp.max(jnp.abs(out - ref)))
    assert max_err < 2e-2, f"max abs err {max_err}"

    print("KERNEL_OK")
</pallas_src>

<mosaic_0001>
module attributes {stable_mosaic.version = 11 : i64} {
  func.func @_refiner_kernel(%arg0: memref<2x16xf32, #tpu.memory_space<vmem>>, %arg1: memref<16x1024xf32, #tpu.memory_space<vmem>>, %arg2: memref<32x16xf32, #tpu.memory_space<vmem>>, %arg3: memref<104x768xbf16, #tpu.memory_space<vmem>>, %arg4: memref<768x768xbf16, #tpu.memory_space<vmem>>, %arg5: memref<768x8xbf16, #tpu.memory_space<vmem>>, %arg6: memref<3x768xf32, #tpu.memory_space<vmem>>, %arg7: memref<2x8xf32, #tpu.memory_space<vmem>>) attributes {dimension_semantics = [], scalar_prefetch = 0 : i64, scratch_operands = 0 : i64, tpu.core_type = #tpu.core_type<tc>} {
    %c0 = arith.constant 0 : index
    %c0_0 = arith.constant 0 : index
    %0 = vector.load %arg0[%c0, %c0_0] : memref<2x16xf32, #tpu.memory_space<vmem>>, vector<2x16xf32>
    %c0_1 = arith.constant 0 : index
    %c0_2 = arith.constant 0 : index
    %1 = vector.load %arg1[%c0_1, %c0_2] : memref<16x1024xf32, #tpu.memory_space<vmem>>, vector<16x1024xf32>
    %cst = arith.constant dense<0.000000e+00> : vector<2x1024xf32>
    %2 = tpu.matmul %0, %1, %cst {dimension_numbers = #tpu.dot_dimension_numbers<[1], [0], [0], [1], [0, 0, 1, 1], [], []>} : vector<2x16xf32>, vector<16x1024xf32>, vector<2x1024xf32> -> vector<2x1024xf32>
    %3 = vector.extract_strided_slice %2 {offsets = [0, 0], sizes = [2, 16], strides = [1, 1]} : vector<2x1024xf32> to vector<2x16xf32>
    %4 = vector.extract_strided_slice %2 {offsets = [0, 128], sizes = [2, 16], strides = [1, 1]} : vector<2x1024xf32> to vector<2x16xf32>
    %5 = vector.extract_strided_slice %2 {offsets = [0, 256], sizes = [2, 16], strides = [1, 1]} : vector<2x1024xf32> to vector<2x16xf32>
    %6 = vector.extract_strided_slice %2 {offsets = [0, 384], sizes = [2, 16], strides = [1, 1]} : vector<2x1024xf32> to vector<2x16xf32>
    %7 = vector.extract_strided_slice %2 {offsets = [0, 512], sizes = [2, 16], strides = [1, 1]} : vector<2x1024xf32> to vector<2x16xf32>
    %8 = vector.extract_strided_slice %2 {offsets = [0, 640], sizes = [2, 32], strides = [1, 1]} : vector<2x1024xf32> to vector<2x32xf32>
    %9 = vector.extract_strided_slice %2 {offsets = [0, 768], sizes = [2, 32], strides = [1, 1]} : vector<2x1024xf32> to vector<2x32xf32>
    %10 = vector.extract_strided_slice %2 {offsets = [0, 896], sizes = [2, 7], strides = [1, 1]} : vector<2x1024xf32> to vector<2x7xf32>
    %11 = arith.mulf %6, %6 : vector<2x16xf32>
    %12 = arith.mulf %7, %7 : vector<2x16xf32>
    %13 = arith.addf %11, %12 : vector<2x16xf32>
    %14 = math.sqrt %13 : vector<2x16xf32>
    %15 = arith.mulf %8, %8 : vector<2x32xf32>
    %16 = arith.mulf %9, %9 : vector<2x32xf32>
    %17 = arith.addf %15, %16 : vector<2x32xf32>
    %c0_3 = arith.constant 0 : index
    %c0_4 = arith.constant 0 : index
    %18 = vector.load %arg2[%c0_3, %c0_4] : memref<32x16xf32, #tpu.memory_space<vmem>>, vector<32x16xf32>
    %cst_5 = arith.constant dense<0.000000e+00> : vector<2x16xf32>
    %19 = tpu.matmul %17, %18, %cst_5 {dimension_numbers = #tpu.dot_dimension_numbers<[1], [0], [0], [1], [0, 0, 1, 1], [], []>} : vector<2x32xf32>, vector<32x16xf32>, vector<2x16xf32> -> vector<2x16xf32>
    %cst_6 = arith.constant dense<0.000000e+00> : vector<2xf32>
    %20 = vector.multi_reduction <add>, %0, %cst_6 [1] : vector<2x16xf32> to vector<2xf32>
    %21 = vector.shape_cast %20 : vector<2xf32> to vector<2x1xf32>
    %cst_7 = arith.constant 1.600000e+01 : f32
    %22 = vector.broadcast %cst_7 : f32 to vector<2x1xf32>
    %23 = arith.divf %21, %22 : vector<2x1xf32>
    %24 = vector.broadcast %23 : vector<2x1xf32> to vector<2x16xf32>
    %25 = arith.subf %0, %24 : vector<2x16xf32>
    %26 = arith.mulf %25, %25 : vector<2x16xf32>
    %cst_8 = arith.constant dense<0.000000e+00> : vector<2xf32>
    %27 = vector.multi_reduction <add>, %26, %cst_8 [1] : vector<2x16xf32> to vector<2xf32>
    %28 = vector.shape_cast %27 : vector<2xf32> to vector<2x1xf32>
    %cst_9 = arith.constant 1.600000e+01 : f32
    %29 = vector.broadcast %cst_9 : f32 to vector<2x1xf32>
    %30 = arith.divf %28, %29 : vector<2x1xf32>
    %cst_10 = arith.constant 9.99999974E-6 : f32
    %31 = vector.broadcast %cst_10 : f32 to vector<2x1xf32>
    %32 = arith.addf %30, %31 : vector<2x1xf32>
    %33 = math.rsqrt %32 : vector<2x1xf32>
    %34 = vector.broadcast %33 : vector<2x1xf32> to vector<2x16xf32>
    %35 = arith.mulf %25, %34 : vector<2x16xf32>
    %cst_11 = arith.constant dense<0.000000e+00> : vector<2xf32>
    %36 = vector.multi_reduction <add>, %3, %cst_11 [1] : vector<2x16xf32> to vector<2xf32>
    %37 = vector.shape_cast %36 : vector<2xf32> to vector<2x1xf32>
    %cst_12 = arith.constant 1.600000e+01 : f32
    %38 = vector.broadcast %cst_12 : f32 to vector<2x1xf32>
    %39 = arith.divf %37, %38 : vector<2x1xf32>
    %40 = vector.broadcast %39 : vector<2x1xf32> to vector<2x16xf32>
    %41 = arith.subf %3, %40 : vector<2x16xf32>
    %42 = arith.mulf %41, %41 : vector<2x16xf32>
    %cst_13 = arith.constant dense<0.000000e+00> : vector<2xf32>
    %43 = vector.multi_reduction <add>, %42, %cst_13 [1] : vector<2x16xf32> to vector<2xf32>
    %44 = vector.shape_cast %43 : vector<2xf32> to vector<2x1xf32>
    %cst_14 = arith.constant 1.600000e+01 : f32
    %45 = vector.broadcast %cst_14 : f32 to vector<2x1xf32>
    %46 = arith.divf %44, %45 : vector<2x1xf32>
    %cst_15 = arith.constant 9.99999974E-6 : f32
    %47 = vector.broadcast %cst_15 : f32 to vector<2x1xf32>
    %48 = arith.addf %46, %47 : vector<2x1xf32>
    %49 = math.rsqrt %48 : vector<2x1xf32>
    %50 = vector.broadcast %49 : vector<2x1xf32> to vector<2x16xf32>
    %51 = arith.mulf %41, %50 : vector<2x16xf32>
    %cst_16 = arith.constant dense<0.000000e+00> : vector<2xf32>
    %52 = vector.multi_reduction <add>, %4, %cst_16 [1] : vector<2x16xf32> to vector<2xf32>
    %53 = vector.shape_cast %52 : vector<2xf32> to vector<2x1xf32>
    %cst_17 = arith.constant 1.600000e+01 : f32
    %54 = vector.broadcast %cst_17 : f32 to vector<2x1xf32>
    %55 = arith.divf %53, %54 : vector<2x1xf32>
    %56 = vector.broadcast %55 : vector<2x1xf32> to vector<2x16xf32>
    %57 = arith.subf %4, %56 : vector<2x16xf32>
    %58 = arith.mulf %57, %57 : vector<2x16xf32>
    %cst_18 = arith.constant dense<0.000000e+00> : vector<2xf32>
    %59 = vector.multi_reduction <add>, %58, %cst_18 [1] : vector<2x16xf32> to vector<2xf32>
    %60 = vector.shape_cast %59 : vector<2xf32> to vector<2x1xf32>
    %cst_19 = arith.constant 1.600000e+01 : f32
    %61 = vector.broadcast %cst_19 : f32 to vector<2x1xf32>
    %62 = arith.divf %60, %61 : vector<2x1xf32>
    %cst_20 = arith.constant 9.99999974E-6 : f32
    %63 = vector.broadcast %cst_20 : f32 to vector<2x1xf32>
    %64 = arith.addf %62, %63 : vector<2x1xf32>
    %65 = math.rsqrt %64 : vector<2x1xf32>
    %66 = vector.broadcast %65 : vector<2x1xf32> to vector<2x16xf32>
    %67 = arith.mulf %57, %66 : vector<2x16xf32>
    %cst_21 = arith.constant dense<0.000000e+00> : vector<2xf32>
    %68 = vector.multi_reduction <add>, %5, %cst_21 [1] : vector<2x16xf32> to vector<2xf32>
    %69 = vector.shape_cast %68 : vector<2xf32> to vector<2x1xf32>
    %cst_22 = arith.constant 1.600000e+01 : f32
    %70 = vector.broadcast %cst_22 : f32 to vector<2x1xf32>
    %71 = arith.divf %69, %70 : vector<2x1xf32>
    %72 = vector.broadcast %71 : vector<2x1xf32> to vector<2x16xf32>
    %73 = arith.subf %5, %72 : vector<2x16xf32>
    %74 = arith.mulf %73, %73 : vector<2x16xf32>
    %cst_23 = arith.constant dense<0.000000e+00> : vector<2xf32>
    %75 = vector.multi_reduction <add>, %74, %cst_23 [1] : vector<2x16xf32> to vector<2xf32>
    %76 = vector.shape_cast %75 : vector<2xf32> to vector<2x1xf32>
    %cst_24 = arith.constant 1.600000e+01 : f32
    %77 = vector.broadcast %cst_24 : f32 to vector<2x1xf32>
    %78 = arith.divf %76, %77 : vector<2x1xf32>
    %cst_25 = arith.constant 9.99999974E-6 : f32
    %79 = vector.broadcast %cst_25 : f32 to vector<2x1xf32>
    %80 = arith.addf %78, %79 : vector<2x1xf32>
    %81 = math.rsqrt %80 : vector<2x1xf32>
    %82 = vector.broadcast %81 : vector<2x1xf32> to vector<2x16xf32>
    %83 = arith.mulf %73, %82 : vector<2x16xf32>
    %cst_26 = arith.constant dense<0.000000e+00> : vector<2xf32>
    %84 = vector.multi_reduction <add>, %14, %cst_26 [1] : vector<2x16xf32> to vector<2xf32>
    %85 = vector.shape_cast %84 : vector<2xf32> to vector<2x1xf32>
    %cst_27 = arith.constant 1.600000e+01 : f32
    %86 = vector.broadcast %cst_27 : f32 to vector<2x1xf32>
    %87 = arith.divf %85, %86 : vector<2x1xf32>
    %88 = vector.broadcast %87 : vector<2x1xf32> to vector<2x16xf32>
    %89 = arith.subf %14, %88 : vector<2x16xf32>
    %90 = arith.mulf %89, %89 : vector<2x16xf32>
    %cst_28 = arith.constant dense<0.000000e+00> : vector<2xf32>
    %91 = vector.multi_reduction <add>, %90, %cst_28 [1] : vector<2x16xf32> to vector<2xf32>
    %92 = vector.shape_cast %91 : vector<2xf32> to vector<2x1xf32>
    %cst_29 = arith.constant 1.600000e+01 : f32
    %93 = vector.broadcast %cst_29 : f32 to vector<2x1xf32>
    %94 = arith.divf %92, %93 : vector<2x1xf32>
    %cst_30 = arith.constant 9.99999974E-6 : f32
    %95 = vector.broadcast %cst_30 : f32 to vector<2x1xf32>
    %96 = arith.addf %94, %95 : vector<2x1xf32>
    %97 = math.rsqrt %96 : vector<2x1xf32>
    %98 = vector.broadcast %97 : vector<2x1xf32> to vector<2x16xf32>
    %99 = arith.mulf %89, %98 : vector<2x16xf32>
    %cst_31 = arith.constant dense<0.000000e+00> : vector<2xf32>
    %100 = vector.multi_reduction <add>, %19, %cst_31 [1] : vector<2x16xf32> to vector<2xf32>
    %101 = vector.shape_cast %100 : vector<2xf32> to vector<2x1xf32>
    %cst_32 = arith.constant 1.600000e+01 : f32
    %102 = vector.broadcast %cst_32 : f32 to vector<2x1xf32>
    %103 = arith.divf %101, %102 : vector<2x1xf32>
    %104 = vector.broadcast %103 : vector<2x1xf32> to vector<2x16xf32>
    %105 = arith.subf %19, %104 : vector<2x16xf32>
    %106 = arith.mulf %105, %105 : vector<2x16xf32>
    %cst_33 = arith.constant dense<0.000000e+00> : vector<2xf32>
    %107 = vector.multi_reduction <add>, %106, %cst_33 [1] : vector<2x16xf32> to vector<2xf32>
    %108 = vector.shape_cast %107 : vector<2xf32> to vector<2x1xf32>
    %cst_34 = arith.constant 1.600000e+01 : f32
    %109 = vector.broadcast %cst_34 : f32 to vector<2x1xf32>
    %110 = arith.divf %108, %109 : vector<2x1xf32>
    %cst_35 = arith.constant 9.99999974E-6 : f32
    %111 = vector.broadcast %cst_35 : f32 to vector<2x1xf32>
    %112 = arith.addf %110, %111 : vector<2x1xf32>
    %113 = math.rsqrt %112 : vector<2x1xf32>
    %114 = vector.broadcast %113 : vector<2x1xf32> to vector<2x16xf32>
    %115 = arith.mulf %105, %114 : vector<2x16xf32>
    %cst_36 = arith.constant dense<0.000000e+00> : vector<2xf32>
    %116 = vector.multi_reduction <add>, %10, %cst_36 [1] : vector<2x7xf32> to vector<2xf32>
    %117 = vector.shape_cast %116 : vector<2xf32> to vector<2x1xf32>
    %cst_37 = arith.constant 7.000000e+00 : f32
    %118 = vector.broadcast %cst_37 : f32 to vector<2x1xf32>
    %119 = arith.divf %117, %118 : vector<2x1xf32>
    %120 = vector.broadcast %119 : vector<2x1xf32> to vector<2x7xf32>
    %121 = arith.subf %10, %120 : vector<2x7xf32>
    %122 = arith.mulf %121, %121 : vector<2x7xf32>
    %cst_38 = arith.constant dense<0.000000e+00> : vector<2xf32>
    %123 = vector.multi_reduction <add>, %122, %cst_38 [1] : vector<2x7xf32> to vector<2xf32>
    %124 = vector.shape_cast %123 : vector<2xf32> to vector<2x1xf32>
    %cst_39 = arith.constant 7.000000e+00 : f32
    %125 = vector.broadcast %cst_39 : f32 to vector<2x1xf32>
    %126 = arith.divf %124, %125 : vector<2x1xf32>
    %cst_40 = arith.constant 9.99999974E-6 : f32
    %127 = vector.broadcast %cst_40 : f32 to vector<2x1xf32>
    %128 = arith.addf %126, %127 : vector<2x1xf32>
    %129 = math.rsqrt %128 : vector<2x1xf32>
    %130 = vector.broadcast %129 : vector<2x1xf32> to vector<2x7xf32>
    %131 = arith.mulf %121, %130 : vector<2x7xf32>
    %cst_41 = arith.constant 0.000000e+00 : f32
    %132 = vector.broadcast %cst_41 : f32 to vector<2x1xf32>
    %133 = tpu.concatenate %35, %51, %67, %83, %99, %115, %131, %132 in 1 : vector<2x16xf32>, vector<2x16xf32>, vector<2x16xf32>, vector<2x16xf32>, vector<2x16xf32>, vector<2x16xf32>, vector<2x7xf32>, vector<2x1xf32> -> vector<2x104xf32>
    %134 = arith.truncf %133 : vector<2x104xf32> to vector<2x104xbf16>
    %c0_42 = arith.constant 0 : index
    %c0_43 = arith.constant 0 : index
    %135 = vector.load %arg6[%c0_42, %c0_43] : memref<3x768xf32, #tpu.memory_space<vmem>>, vector<1x768xf32>
    %c1 = arith.constant 1 : index
    %c0_44 = arith.constant 0 : index
    %136 = vector.load %arg6[%c1, %c0_44] : memref<3x768xf32, #tpu.memory_space<vmem>>, vector<1x768xf32>
    %c0_45 = arith.constant 0 : index
    %c0_46 = arith.constant 0 : index
    %137 = vector.load %arg3[%c0_45, %c0_46] : memref<104x768xbf16, #tpu.memory_space<vmem>>, vector<104x768xbf16>
    %cst_47 = arith.constant dense<0.000000e+00> : vector<2x768xf32>
    %138 = tpu.matmul %134, %137, %cst_47 {dimension_numbers = #tpu.dot_dimension_numbers<[1], [0], [0], [1], [0, 0, 1, 1], [], []>} : vector<2x104xbf16>, vector<104x768xbf16>, vector<2x768xf32> -> vector<2x768xf32>
    %139 = vector.broadcast %135 : vector<1x768xf32> to vector<2x768xf32>
    %140 = arith.addf %138, %139 : vector<2x768xf32>
    %cst_48 = arith.constant 0.000000e+00 : f32
    %141 = vector.broadcast %cst_48 : f32 to vector<2x768xf32>
    %142 = arith.maximumf %140, %141 : vector<2x768xf32>
    %143 = arith.truncf %142 : vector<2x768xf32> to vector<2x768xbf16>
    %c0_49 = arith.constant 0 : index
    %c0_50 = arith.constant 0 : index
    %144 = vector.load %arg4[%c0_49, %c0_50] : memref<768x768xbf16, #tpu.memory_space<vmem>>, vector<768x768xbf16>
    %cst_51 = arith.constant dense<0.000000e+00> : vector<2x768xf32>
    %145 = tpu.matmul %143, %144, %cst_51 {dimension_numbers = #tpu.dot_dimension_numbers<[1], [0], [0], [1], [0, 0, 1, 1], [], []>} : vector<2x768xbf16>, vector<768x768xbf16>, vector<2x768xf32> -> vector<2x768xf32>
    %146 = vector.broadcast %136 : vector<1x768xf32> to vector<2x768xf32>
    %147 = arith.addf %145, %146 : vector<2x768xf32>
    %cst_52 = arith.constant 0.000000e+00 : f32
    %148 = vector.broadcast %cst_52 : f32 to vector<2x768xf32>
    %149 = arith.maximumf %147, %148 : vector<2x768xf32>
    %150 = arith.truncf %149 : vector<2x768xf32> to vector<2x768xbf16>
    %c0_53 = arith.constant 0 : index
    %c0_54 = arith.constant 0 : index
    %151 = vector.load %arg5[%c0_53, %c0_54] : memref<768x8xbf16, #tpu.memory_space<vmem>>, vector<768x8xbf16>
    %cst_55 = arith.constant dense<0.000000e+00> : vector<2x8xf32>
    %152 = tpu.matmul %150, %151, %cst_55 {dimension_numbers = #tpu.dot_dimension_numbers<[1], [0], [0], [1], [0, 0, 1, 1], [], []>} : vector<2x768xbf16>, vector<768x8xbf16>, vector<2x8xf32> -> vector<2x8xf32>
    %c2 = arith.constant 2 : index
    %c0_56 = arith.constant 0 : index
    %153 = vector.load %arg6[%c2, %c0_56] : memref<3x768xf32, #tpu.memory_space<vmem>>, vector<1x8xf32>
    %154 = vector.broadcast %153 : vector<1x8xf32> to vector<2x8xf32>
    %155 = arith.addf %152, %154 : vector<2x8xf32>
    %c0_57 = arith.constant 0 : index
    %c0_58 = arith.constant 0 : index
    %156 = vector.load %arg7[%c0_57, %c0_58] : memref<2x8xf32, #tpu.memory_space<vmem>>, vector<2x8xf32>
    tpu.vector_store %arg7[%c0_57, %c0_58], %155 {strides = array<i32>} : memref<2x8xf32, #tpu.memory_space<vmem>>, vector<2x8xf32>,
    return
  }
}

</mosaic_0001>

<bundles_post_ra>
// kernel: refiner_forward.1
= control target key start
LH: loop header
LB: loop body
LE: loop exit
PB: predicated region body
PF: predicated region fallthrough
CT: control target
= control target key end

     0   :  { %12 = vsyncpa [#allocation3], 0  ;;  %s5386_s0 = inlined_call_operand.hbm [shape: f32[2,16], index: 0, kind: input, shape index: {}]   ;;  %s5387_s1 = inlined_call_operand.hbm [shape: f32[16,1024], index: 1, kind: input, shape index: {}]   ;;  %s5388_s2 = inlined_call_operand.vmem [shape: f32[32,16], index: 2, kind: input, shape index: {}]   ;;  %s5389_s3 = inlined_call_operand.hbm [shape: bf16[104,768], index: 3, kind: input, shape index: {}]   ;;  %s5390_s4 = inlined_call_operand.hbm [shape: bf16[768,768], index: 4, kind: input, shape index: {}]   ;;  %s5391_s5 = inlined_call_operand.vmem [shape: bf16[768,8], index: 5, kind: input, shape index: {}]   ;;  %s5392_s6 = inlined_call_operand.hbm [shape: f32[3,768], index: 6, kind: input, shape index: {}]   ;;  %s5393_s7 = inlined_call_operand.hbm [shape: f32[2,8], index: 7, kind: output, shape index: {}]  }
   0x1   :  { %13 = vsyncpa [#allocation6], 0 }
   0x2   :  { %14 = vsyncpa [#allocation9], 0 }
   0x3   :  { %15 = vsyncpa [#allocation4], 0  ;;  %s4954_s24 = smov [#allocation5]   ;;  %s4814_s28 = scalar_lea.hbm %s5387_s1, 2048 }
   0x4   :  { %s31_s25 = sshll.u32 %s4954_s24, 4  ;;  %p4815_p0 = scmp.ne.s32.totalorder %s5387_s1, %s4814_s28  ;;  %s32_s25 = int_to_ptr.vmem [resolvable:$true] %s31_s25 }
   0x5   :  { %p4818_p1 = scmp.lt.u32.totalorder %s4814_s28, %s5387_s1 }
   0x7   :  { %p4820_p2 = pnand %p4818_p1, %p4815_p0 }
   0x9   :  { %4823 = shalt.err (!%p4820_p2)
}
   0xa   :  { %s4824_s10 = scalar_lea.vmem %s32_s25, 2048  ;;  %p4829_p4 = scmp.lt.s32.totalorder %s32_s25, %s32_s25 }
   0xb   :  { %p4825_p3 = scmp.ne.s32.totalorder %s32_s25, %s4824_s10  ;;  %p4830_p5 = scmp.lt.s32.totalorder %s4824_s10, %s4824_s10 }
   0xd   :  { %p4831_p6 = por %p4830_p5, %p4829_p4 }
   0xf   :  { %p4832_p7 = pnand %p4831_p6, %p4825_p3 }
  0x11   :  { %4835 = shalt.err (!%p4832_p7)
}
  0x12   :  { %s4955_s11 = smov 1024   ;;  %s4956_s12 = smov 64  }
  0x13   :  { %37 = dma.hbm_to_vmem [thread:$0]  %s5387_s1, 2048, %s32_s25, [#allocation6], %s4955_s11, %s4955_s11, %s4956_s12  }
  0x14   :  { %s4957_s15 = smov [#allocation8]   ;;  %s4958_s17 = smov [#allocation2]  }
  0x15   :  { %s57_s16 = sshll.u32 %s4957_s15, 4  ;;  %s22_s18 = sshll.u32 %s4958_s17, 4  ;;  %s58_s16 = int_to_ptr.vmem [resolvable:$true] %s57_s16  ;;  %s23_s18 = int_to_ptr.vmem [resolvable:$true] %s22_s18 }
  0x16   :  { %s4836_s21 = scalar_lea.hbm %s5390_s4, 36864 }
  0x17   :  { %p4837_p8 = scmp.ne.s32.totalorder %s5390_s4, %s4836_s21  ;;  %p4840_p9 = scmp.lt.u32.totalorder %s4836_s21, %s5390_s4 }
  0x19   :  { %p4842_p10 = pnand %p4840_p9, %p4837_p8 }
  0x1b   :  { %4845 = shalt.err (!%p4842_p10)
}
  0x1c   :  { %s4846_s1 = scalar_lea.vmem %s58_s16, 36864  ;;  %p4851_p12 = scmp.lt.s32.totalorder %s58_s16, %s58_s16 }
  0x1d   :  { %p4847_p11 = scmp.ne.s32.totalorder %s58_s16, %s4846_s1  ;;  %p4852_p13 = scmp.lt.s32.totalorder %s4846_s1, %s4846_s1 }
  0x1f   :  { %p4853_p0 = por %p4852_p13, %p4851_p12 }
  0x21   :  { %p4854_p1 = pnand %p4853_p0, %p4847_p11 }
  0x23   :  { %4857 = shalt.err (!%p4854_p1)
}
  0x24   :  { %s4959_s25 = smov 384   ;;  %s4960_s27 = smov 24  }
  0x25   :  { %63 = dma.hbm_to_vmem [thread:$0]  %s5390_s4, 36864, %s58_s16, [#allocation9], %s4959_s25, %s4959_s25, %s4960_s27  }
  0x26   :  { %s4858_s9 = scalar_lea.hbm %s5386_s0, 32 }
  0x27   :  { %p4859_p2 = scmp.ne.s32.totalorder %s5386_s0, %s4858_s9  ;;  %p4862_p3 = scmp.lt.u32.totalorder %s4858_s9, %s5386_s0 }
  0x29   :  { %p4864_p4 = pnand %p4862_p3, %p4859_p2 }
  0x2b   :  { %4867 = shalt.err (!%p4864_p4)
}
  0x2c   :  { %s4868_s15 = scalar_lea.vmem %s23_s18, 32  ;;  %p4873_p6 = scmp.lt.s32.totalorder %s23_s18, %s23_s18 }
  0x2d   :  { %p4869_p5 = scmp.ne.s32.totalorder %s23_s18, %s4868_s15  ;;  %p4874_p7 = scmp.lt.s32.totalorder %s4868_s15, %s4868_s15 }
  0x2f   :  { %p4875_p8 = por %p4874_p7, %p4873_p6 }
  0x31   :  { %p4876_p9 = pnand %p4875_p8, %p4869_p5 }
  0x33   :  { %4879 = shalt.err (!%p4876_p9)
}
  0x34   :  { %25 = dma.hbm_to_vmem [thread:$0]  %s5386_s0, 32, %s23_s18, [#allocation3]  }
  0x35   :  { %s4961_s17 = smov [#allocation7]   ;;  %s4962_s20 = smov [#allocation10]  }
  0x36   :  { %s45_s19 = sshll.u32 %s4961_s17, 4  ;;  %s72_s21 = sshll.u32 %s4962_s20, 4  ;;  %s46_s19 = int_to_ptr.vmem [resolvable:$true] %s45_s19  ;;  %s73_s21 = int_to_ptr.vmem [resolvable:$true] %s72_s21 }
  0x37   :  { %s4880_s24 = scalar_lea.hbm %s5389_s3, 4992 }
  0x38   :  { %p4881_p10 = scmp.ne.s32.totalorder %s5389_s3, %s4880_s24  ;;  %p4884_p11 = scmp.lt.u32.totalorder %s4880_s24, %s5389_s3 }
  0x3a   :  { %p4886_p12 = pnand %p4884_p11, %p4881_p10 }
  0x3c   :  { %4889 = shalt.err (!%p4886_p12)
}
  0x3d   :  { %s4890_s0 = scalar_lea.vmem %s46_s19, 4992  ;;  %p4895_p0 = scmp.lt.s32.totalorder %s46_s19, %s46_s19 }
  0x3e   :  { %p4891_p13 = scmp.ne.s32.totalorder %s46_s19, %s4890_s0  ;;  %p4896_p1 = scmp.lt.s32.totalorder %s4890_s0, %s4890_s0 }
  0x40   :  { %p4897_p2 = por %p4896_p1, %p4895_p0 }
  0x42   :  { %p4898_p3 = pnand %p4897_p2, %p4891_p13 }
  0x44   :  { %4901 = shalt.err (!%p4898_p3)
}
  0x45   :  { %51 = dma.hbm_to_vmem [thread:$0]  %s5389_s3, 4992, %s46_s19, [#allocation6], %s4959_s25, %s4959_s25, %s4960_s27  }
  0x46   :  { %s4902_s10 = scalar_lea.hbm %s5392_s6, 384 }
  0x47   :  { %p4903_p4 = scmp.ne.s32.totalorder %s5392_s6, %s4902_s10  ;;  %p4906_p5 = scmp.lt.u32.totalorder %s4902_s10, %s5392_s6 }
  0x49   :  { %p4908_p6 = pnand %p4906_p5, %p4903_p4 }
  0x4b   :  { %4911 = shalt.err (!%p4908_p6)
}
  0x4c   :  { %s4912_s4 = scalar_lea.vmem %s73_s21, 384  ;;  %p4917_p8 = scmp.lt.s32.totalorder %s73_s21, %s73_s21 }
  0x4d   :  { %p4913_p7 = scmp.ne.s32.totalorder %s73_s21, %s4912_s4  ;;  %p4918_p9 = scmp.lt.s32.totalorder %s4912_s4, %s4912_s4 }
  0x4f   :  { %p4919_p10 = por %p4918_p9, %p4917_p8 }
  0x51   :  { %p4920_p11 = pnand %p4919_p10, %p4913_p7 }
  0x53   :  { %4923 = shalt.err (!%p4920_p11)
}
  0x54   :  { %75 = dma.hbm_to_vmem [thread:$0]  %s5392_s6, 384, %s73_s21, [#allocation9]  }
  0x55   :  { %4946 = dma.done.wait [#allocation3], 32  }
  0x56   :  { %4947 = vsyncadd [#allocation3], 4294967264 }
  0x57   :  { %4948 = dma.done.wait [#allocation6], 7040  }
  0x58   :  { %4949 = vsyncadd [#allocation6], 4294960256 }
  0x59   :  { %4950 = dma.done.wait [#allocation9], 37248  }
  0x5a   :  { %4951 = vsyncadd [#allocation9], 4294930048  ;;  %v4963_v0 = vmov 0.0   ;;  %v94_v1 = vld [vmem:[#allocation5 + $0x8] sm:$0xff]  ;;  %v96_v3 = vld [vmem:[#allocation5 + $0x18] sm:$0xff]  ;;  %vm109_vm0 = vcmask 130048  }
  0x5b   :  { %177 = vmatprep.mubr.f32.mxu0 %v4963_v0  ;;  %248 = vmatprep.mubr.f32.mxu1 %v4963_v0  ;;  %v102_v2 = vld [vmem:[#allocation5 + $0x48] sm:$0xff]  ;;  %v104_v5 = vld [vmem:[#allocation5 + $0x58] sm:$0xff]  ;;  %v93_v6 = vld [vmem:[#allocation5] sm:$0xff]  ;;  %v4964_v28 = vmov 0.0|0.0   ;;  %vm4965_vm1 = vmmov 0   ;;  %vm488_vm2 = vcmask 123904  }
  0x5c   :  { %v4186_v4 = vpack.c.bf16 %v102_v2, %v94_v1  ;;  %v101_v7 = vld [vmem:[#allocation5 + $0x40] sm:$0xff]  ;;  %v4190_v8 = vpack.c.bf16 %v104_v5, %v96_v3  ;;  %v95_v10 = vld [vmem:[#allocation5 + $0x10] sm:$0xff]  ;;  %v92_v12 = vld [vmem:[#allocation2] sm:$0x3]  ;;  %vm414_vm3 = vcmask 261120   ;;  %vm568_vm6 = vcmask 50176  }
  0x5d   :  { %v4188_v9 = vpack.c.bf16 %v101_v7, %v93_v6  ;;  %v103_v11 = vld [vmem:[#allocation5 + $0x50] sm:$0xff]  ;;  %v98_v14 = vld [vmem:[#allocation5 + $0x28] sm:$0xff]  ;;  %v97_v16 = vld [vmem:[#allocation5 + $0x20] sm:$0xff]  ;;  %s4967_s23 = smov 32   ;;  %s4968_s24 = smov 48   ;;  %vm892_vm7 = vcmask 1043456  }
  0x5e   :  { %4187 = vmatprep.subr.bf16.mxu0 %v4186_v4  ;;  %v4192_v13 = vpack.c.bf16 %v103_v11, %v95_v10  ;;  %v106_v15 = vld [vmem:[#allocation5 + $0x68] sm:$0xff]  ;;  %4191 = vmatprep.subr.bf16.mxu1 %v4190_v8  ;;  %v105_v18 = vld [vmem:[#allocation5 + $0x60] sm:$0xff]  ;;  %v100_v19 = vld [vmem:[#allocation5 + $0x38] sm:$0xff]  ;;  %s4969_s26 = smov 96   ;;  %vm609_vm8 = vcmask 392192   ;;  %vm611_vm9 = vcmask 523264  }
  0x5f   :  { %4189 = vmatpush1.bf16.msra.mxu0 %v4188_v9  ;;  %v4194_v17 = vpack.c.bf16 %v106_v15, %v98_v14  ;;  %v108_v20 = vld [vmem:[#allocation5 + $0x78] sm:$0xff]  ;;  %v4196_v21 = vpack.c.bf16 %v105_v18, %v97_v16  ;;  %v99_v23 = vld [vmem:[#allocation5 + $0x30] sm:$0xff]  ;;  %v411_v27 = vld [vmem:[%s5388_s2 + $0x8] sm:$0xff]  ;;  %vm613_vm10 = vcmask 654336   ;;  %vm615_vm11 = vcmask 785408  }
  0x60   :  { %4193 = vmatpush1.bf16.msra.mxu1 %v4192_v13  ;;  %v4198_v22 = vpack.c.bf16 %v108_v20, %v100_v19  ;;  %v107_v24 = vld [vmem:[#allocation5 + $0x70] sm:$0xff]  ;;  %v410_v26 = vld [vmem:[%s5388_s2] sm:$0xff]  ;;  %vm617_vm12 = vcmask 842752   ;;  %vm888_vm13 = vcmask 850944   ;;  %vm3695_vm14 = vcmask 58368  }
  0x61   :  { %4195 = vmatprep.subr.bf16.mxu0 %v4194_v17  ;;  %v4200_v25 = vpack.c.bf16 %v107_v24, %v99_v23  ;;  %v4203_v29 = vpack.c.bf16 %v411_v27, %v410_v26  ;;  %v412_v30 = vld [vmem:[%s5388_s2 + $0x10] sm:$0xff]  ;;  %v413_v31 = vld [vmem:[%s5388_s2 + $0x18] sm:$0xff]  ;;  %s4966_s2 = smov 16  }
  0x62   :  { %3714 = vmatmul.mubr.msk.f32.vlgmr.msra.gmra.mrb[0].mxu0 %vm109_vm0, %v92_v12  ;;  %4199 = vmatprep.subr.bf16.mxu1 %v4198_v22  ;;  %v4206_v32 = vpack.c.bf16 %v413_v31, %v412_v30 }
  0x63   :  { %3715 = vmatmul.mubr.msk.f32.vlgmr.msra.gmra.mrb[0].mxu1 %vm109_vm0, %v92_v12  ;;  %4197 = vmatpush1.bf16.msra.mxu0 %v4196_v21 }
  0x64   :  { %4201 = vmatpush1.bf16.msra.mxu1 %v4200_v25  ;;  %319 = vmatprep.mubr.f32.mxu0 %v4963_v0 }
  0x65   :  { %390 = vmatprep.mubr.f32.mxu1 %v4963_v0  ;;  %4202 = vmatprep.subr.bf16.mxu1 %v4964_v28 }
  0x66   :  { %3716 = vmatmul.mubr.msk.f32.vlgmr.msra.gmra.mrb[2].mxu0 %vm109_vm0, %v92_v12 }
  0x67   :  { %3717 = vmatmul.mubr.msk.f32.vlgmr.msra.gmra.mrb[2].mxu1 %vm109_vm0, %v92_v12  ;;  %v4813_v12 = vld [vmem:[#allocation2] sm:$0x3] }
  0x68   :  { %4204 = vmatpush3.bf16.msra.mxu1 %v4203_v29  ;;  %4183 = vmatprep.mubr.msk.f32.mxu1 %vm4965_vm1, %v4963_v0  ;;  %v489_v13 = vsel %vm488_vm2, %v4813_v12, 0.0 }
  0x69   :  { %4205 = vmatprep.subr.bf16.mxu1 %v4964_v28 }
  0x6c   :  { %4207 = vmatpush3.bf16.msra.mxu1 %v4206_v32 }
 0x135   :  { %v179_v33 = vpop.f32.mrb[0].mxu0 }
 0x136   :  { %v250_v34 = vpop.f32.mrb[0].mxu1  ;;  %v181_v35 = vpop.f32.mrb[1].mxu0  ;;  %v503_v36 = vsel %vm488_vm2, %v179_v33, 0.0 }
 0x137   :  { %v529_v37 = vsel %vm488_vm2, %v250_v34, 0.0  ;;  %v252_v38 = vpop.f32.mrb[1].mxu1  ;;  %504 = vadd.xlane.f32.xlu0 %v503_v36  ;;  %v516_v44 = vsel %vm488_vm2, %v181_v35, 0.0 }
 0x138   :  { %530 = vadd.xlane.f32.xlu1 %v529_v37  ;;  %v397_v40 = vmul.f32 %v252_v38, %v252_v38 }
 0x139   :  { %v321_v39 = vpop.f32.mrb[2].mxu0 }
 0x13a   :  { %v398_v41 = vmul.f32 %v321_v39, %v321_v39  ;;  %v323_v42 = vpop.f32.mrb[3].mxu0  ;;  %v392_v43 = vpop.f32.mrb[2].mxu1 }
 0x13b   :  { %v407_v45 = vmul.f32 %v323_v42, %v323_v42  ;;  %v408_v46 = vmul.f32 %v392_v43, %v392_v43  ;;  %v394_v47 = vpop.f32.mrb[3].mxu1  ;;  %517 = vadd.xlane.f32.xlu0 %v516_v44 }
 0x13c   :  { %v399_v48 = vadd.f32 %v398_v41, %v397_v40  ;;  %v569_v56 = vsel %vm568_vm6, %v394_v47, 0.0 }
 0x13d   :  { %v409_v49 = vadd.f32 %v408_v46, %v407_v45 }
 0x13e   :  { %4797 = vrsqrt.f32 %v399_v48  ;;  %vm402_vm4 = vcmp.eq.f32.partialorder %v399_v48, inf  ;;  %v405_v52 = vand.u32 2147483648, %v399_v48  ;;  %vm404_vm5 = vcmp.eq.f32.partialorder %v399_v48, 0.0 }
 0x13f   :  { %4184 = vmatmul.mubr.msk.f32.vlgmr.msra.gmra.mrb[4].mxu1 %vm414_vm3, %v409_v49 }
 0x148   :  { %v4798_v50 = vpop.eup %4797 }
 0x149   :  { %v401_v51 = vmul.f32 %v4798_v50, %v399_v48 }
 0x14b   :  { %v403_v53 = vsel %vm402_vm4, %v399_v48, %v401_v51 }
 0x14c   :  { %v406_v54 = vsel %vm404_vm5, %v405_v52, %v403_v53 }
 0x14d   :  { %v542_v55 = vsel %vm488_vm2, %v406_v54, 0.0 }
 0x14e   :  { %543 = vadd.xlane.f32.xlu1 %v542_v55 }
 0x152   :  { %570 = vadd.xlane.f32.xlu1 %v569_v56 }
 0x1c4   :  { %v505_v57 = vpop.xlane.xlu0 %504 }
 0x1c5   :  { %v531_v58 = vpop.xlane.xlu1 %530  ;;  %v506_v59 = vmul.f32 0.0625, %v505_v57 }
 0x1c6   :  { %v532_v60 = vmul.f32 0.0625, %v531_v58  ;;  %v4257_v58 = vld [vmem:[#allocation7] ss:$24 sps:$4 sm:$0xff]  }
 0x1c7   :  { %v507_v61 = vsub.f32 %v179_v33, %v506_v59  ;;  %v4259_v59 = vld [vmem:[#allocation7 + $0x4] ss:$24 sps:$4 sm:$0xff]  }
 0x1c8   :  { %v5102_v62 = vsub.f32 %v250_v34, %v532_v60  ;;  %v518_v3 = vpop.xlane.xlu0 %517  ;;  %v4262_v60 = vld [vmem:[#allocation7 + $0x34] ss:$24 sps:$4 sm:$0xff]   ;;  %911 = vmatprep.subr.bf16.mxu1 %v4259_v59 }
 0x1c9   :  { %v508_v63 = vmul.f32 %v507_v61, %v507_v61  ;;  %v519_v5 = vmul.f32 0.0625, %v518_v3  ;;  %912 = vmatpush1.bf16.msra.mxu1 %v4257_v58  ;;  %v4269_v3 = vld [vmem:[#allocation7 + $0xc0] ss:$24 sps:$4 sm:$0xff]  }
 0x1ca   :  { %v534_v1 = vmul.f32 %v5102_v62, %v5102_v62  ;;  %913 = vmatprep.subr.bf16.mxu1 %v4262_v60 }
 0x1cb   :  { %v509_v0 = vsel %vm488_vm2, %v508_v63, 0.0  ;;  %v520_v7 = vsub.f32 %v181_v35, %v519_v5  ;;  %v4265_v63 = vld [vmem:[#allocation7 + $0x64] ss:$24 sps:$4 sm:$0xff]   ;;  %v4272_v5 = vld [vmem:[#allocation7 + $0xf0] ss:$24 sps:$4 sm:$0xff]  }
 0x1cc   :  { %510 = vadd.xlane.f32.xlu1 %v509_v0  ;;  %v535_v2 = vsel %vm488_vm2, %v534_v1, 0.0  ;;  %v4268_v0 = vld [vmem:[#allocation7 + $0x94] ss:$24 sps:$4 sm:$0xff]   ;;  %v4266_v1 = vld [vmem:[#allocation7 + $0x90] ss:$24 sps:$4 sm:$0xff]  }
 0x1cd   :  { %v521_v16 = vmul.f32 %v520_v7, %v520_v7 }
 0x1cf   :  { %v522_v18 = vsel %vm488_vm2, %v521_v16, 0.0 }
 0x1d0   :  { %536 = vadd.xlane.f32.xlu1 %v535_v2  ;;  %v4271_v2 = vld [vmem:[#allocation7 + $0xc4] ss:$24 sps:$4 sm:$0xff]  }
 0x1db   :  { %v544_v4 = vpop.xlane.xlu1 %543 }
 0x1dc   :  { %v545_v8 = vmul.f32 0.0625, %v544_v4  ;;  %v4274_v4 = vld [vmem:[#allocation7 + $0xf4] ss:$24 sps:$4 sm:$0xff]  }
 0x1de   :  { %v546_v14 = vsub.f32 %v406_v54, %v545_v8 }
 0x1df   :  { %v571_v11 = vpop.xlane.xlu1 %570 }
 0x1e0   :  { %v573_v15 = vmul.f32 0.14285715, %v571_v11  ;;  %v547_v19 = vmul.f32 %v546_v14, %v546_v14 }
 0x1e2   :  { %v574_v17 = vsub.f32 %v394_v47, %v573_v15  ;;  %v548_v20 = vsel %vm488_vm2, %v547_v19, 0.0  ;;  %v4325_v19 = vld [vmem:[#allocation8 + $0x34] ss:$24 sps:$4 sm:$0xff]  }
 0x1e4   :  { %v575_v21 = vmul.f32 %v574_v17, %v574_v17 }
 0x1e6   :  { %v576_v22 = vsel %vm568_vm6, %v575_v21, 0.0  ;;  %v4331_v21 = vld [vmem:[#allocation8 + $0x64] ss:$24 sps:$4 sm:$0xff]  }
 0x212   :  { %v484_v6 = vpop.f32.mrb[4].mxu1 }
 0x213   :  { %v4185_v9 = vpop.f32.mrb[5].mxu1  ;;  %v555_v10 = vsel %vm488_vm2, %v484_v6, 0.0 }
 0x214   :  { %556 = vadd.xlane.f32.xlu0 %v555_v10  ;;  %v659_v9 = vld [vmem:[#allocation7 + $0x120] sm:$0xff] }
 0x215   :  { %v3756_v10 = vcombine.high %v659_v9, %v659_v9  ;;  %v3755_v11 = vcombine.low %v659_v9, %v659_v9  ;;  %v4294_v9 = vld [vmem:[#allocation7 + $0xfc] ss:$24 sps:$4 sm:$0xff]  }
 0x218   :  { %490 = vadd.xlane.f32.xlu0 %v489_v13  ;;  %v4279_v13 = vld [vmem:[#allocation7 + $0xc] ss:$24 sps:$4 sm:$0xff]  }
 0x21c   :  { %523 = vadd.xlane.f32.xlu0 %v522_v18  ;;  %v4319_v18 = vld [vmem:[#allocation8 + $0x4] ss:$24 sps:$4 sm:$0xff]  }
 0x21d   :  { %2805 = vmatprep.subr.bf16.mxu0 %v4319_v18  ;;  %v4302_v18 = vld [vmem:[#allocation7 + $0x44] ss:$24 sps:$4 sm:$0xff]  }
 0x220   :  { %549 = vadd.xlane.f32.xlu0 %v548_v20  ;;  %v4323_v20 = vld [vmem:[#allocation8 + $0x30] ss:$24 sps:$4 sm:$0xff]  }
 0x224   :  { %577 = vadd.xlane.f32.xlu0 %v576_v22  ;;  %v4329_v22 = vld [vmem:[#allocation8 + $0x60] ss:$24 sps:$4 sm:$0xff]  }
 0x259   :  { %v511_v23 = vpop.xlane.xlu1 %510 }
 0x25a   :  { %v512_v24 = vmul.f32 0.0625, %v511_v23  ;;  %v4337_v23 = vld [vmem:[#allocation8 + $0x94] ss:$24 sps:$4 sm:$0xff]  }
 0x25c   :  { %v513_v25 = vadd.f32 1e-05, %v512_v24  ;;  %v4335_v24 = vld [vmem:[#allocation8 + $0x90] ss:$24 sps:$4 sm:$0xff]  }
 0x25d   :  { %v537_v34 = vpop.xlane.xlu1 %536 }
 0x25e   :  { %4799 = vrsqrt.f32 %v513_v25  ;;  %v538_v40 = vmul.f32 0.0625, %v537_v34  ;;  %v4343_v25 = vld [vmem:[#allocation8 + $0xc4] ss:$24 sps:$4 sm:$0xff]  }
 0x25f   :  { %v4367_v34 = vld [vmem:[#allocation8 + $0x184] ss:$24 sps:$4 sm:$0xff]  }
 0x260   :  { %v539_v44 = vadd.f32 1e-05, %v538_v40 }
 0x268   :  { %v4800_v26 = vpop.eup %4799 }
 0x269   :  { %v515_v27 = vmul.f32 %v4800_v26, %v507_v61  ;;  %v4260_v61 = vld [vmem:[#allocation7 + $0x30] ss:$24 sps:$4 sm:$0xff]  }
 0x26a   :  { %914 = vmatpush1.bf16.msra.mxu1 %v4260_v61  ;;  %v4341_v26 = vld [vmem:[#allocation8 + $0xc0] ss:$24 sps:$4 sm:$0xff]  }
 0x26b   :  { %584 = vrot.lane.b32.xlu0 %v515_v27, %s4966_s2  ;;  %915 = vmatprep.subr.bf16.mxu1 %v4265_v63  ;;  %v4349_v27 = vld [vmem:[#allocation8 + $0xf4] ss:$24 sps:$4 sm:$0xff]  }
 0x2a1   :  { %v557_v28 = vpop.xlane.xlu0 %556 }
 0x2a2   :  { %v558_v29 = vmul.f32 0.0625, %v557_v28  ;;  %v4347_v28 = vld [vmem:[#allocation8 + $0xf0] ss:$24 sps:$4 sm:$0xff]  }
 0x2a4   :  { %v5113_v30 = vsub.f32 %v484_v6, %v558_v29  ;;  %v4355_v29 = vld [vmem:[#allocation8 + $0x124] ss:$24 sps:$4 sm:$0xff]  }
 0x2a5   :  { %v491_v31 = vpop.xlane.xlu0 %490 }
 0x2a6   :  { %v493_v32 = vmul.f32 0.0625, %v491_v31  ;;  %v560_v33 = vmul.f32 %v5113_v30, %v5113_v30  ;;  %v4361_v31 = vld [vmem:[#allocation8 + $0x154] ss:$24 sps:$4 sm:$0xff]  }
 0x2a8   :  { %v5117_v35 = vsub.f32 %v4813_v12, %v493_v32  ;;  %v561_v36 = vsel %vm488_vm2, %v560_v33, 0.0  ;;  %v894_v12 = vsel %vm892_vm7, %v3755_v11, 0  ;;  %v4359_v32 = vld [vmem:[#allocation8 + $0x150] ss:$24 sps:$4 sm:$0xff]   ;;  %v4292_v11 = vld [vmem:[#allocation7 + $0xf8] ss:$24 sps:$4 sm:$0xff]  }
 0x2a9   :  { %562 = vadd.xlane.f32.xlu1 %v561_v36  ;;  %v524_v37 = vpop.xlane.xlu0 %523  ;;  %v4365_v36 = vld [vmem:[#allocation8 + $0x180] ss:$24 sps:$4 sm:$0xff]  }
 0x2aa   :  { %v525_v38 = vmul.f32 0.0625, %v524_v37  ;;  %v495_v39 = vmul.f32 %v5117_v35, %v5117_v35 }
 0x2ac   :  { %v526_v41 = vadd.f32 1e-05, %v525_v38  ;;  %v496_v42 = vsel %vm488_vm2, %v495_v39, 0.0  ;;  %v4373_v38 = vld [vmem:[#allocation8 + $0x1b4] ss:$24 sps:$4 sm:$0xff]  }
 0x2ad   :  { %497 = vadd.xlane.f32.xlu1 %v496_v42  ;;  %v550_v43 = vpop.xlane.xlu0 %549  ;;  %v4371_v39 = vld [vmem:[#allocation8 + $0x1b0] ss:$24 sps:$4 sm:$0xff]   ;;  %v4377_v42 = vld [vmem:[#allocation8 + $0x1e0] ss:$24 sps:$4 sm:$0xff]  }
 0x2ae   :  { %4801 = vrsqrt.f32 %v526_v41  ;;  %v551_v45 = vmul.f32 0.0625, %v550_v43  ;;  %v4379_v41 = vld [vmem:[#allocation8 + $0x1e4] ss:$24 sps:$4 sm:$0xff]   ;;  %v4385_v43 = vld [vmem:[#allocation8 + $0x214] ss:$24 sps:$4 sm:$0xff]  }
 0x2af   :  { %4803 = vrsqrt.f32 %v539_v44  ;;  %v4383_v44 = vld [vmem:[#allocation8 + $0x210] ss:$24 sps:$4 sm:$0xff]  }
 0x2b0   :  { %v552_v47 = vadd.f32 1e-05, %v551_v45  ;;  %v4391_v45 = vld [vmem:[#allocation8 + $0x244] ss:$24 sps:$4 sm:$0xff]  }
 0x2b1   :  { %v578_v46 = vpop.xlane.xlu0 %577 }
 0x2b2   :  { %v579_v48 = vmul.f32 0.14285715, %v578_v46  ;;  %4805 = vrsqrt.f32 %v552_v47  ;;  %v4389_v46 = vld [vmem:[#allocation8 + $0x240] ss:$24 sps:$4 sm:$0xff]  }
 0x2b4   :  { %v580_v49 = vadd.f32 1e-05, %v579_v48  ;;  %v4397_v48 = vld [vmem:[#allocation8 + $0x274] ss:$24 sps:$4 sm:$0xff]  }
 0x2b6   :  { %4807 = vrsqrt.f32 %v580_v49 }
 0x2b8   :  { %v4802_v50 = vpop.eup %4801 }
 0x2b9   :  { %v528_v51 = vmul.f32 %v4802_v50, %v520_v7  ;;  %v4804_v52 = vpop.eup %4803  ;;  %v4395_v50 = vld [vmem:[#allocation8 + $0x270] ss:$24 sps:$4 sm:$0xff]  }
 0x2ba   :  { %v541_v53 = vmul.f32 %v4804_v52, %v5102_v62  ;;  %v4263_v62 = vld [vmem:[#allocation7 + $0x60] ss:$24 sps:$4 sm:$0xff]  }
 0x2bb   :  { %916 = vmatpush1.bf16.msra.mxu1 %v4263_v62  ;;  %v4277_v62 = vld [vmem:[#allocation7 + $0x8] ss:$24 sps:$4 sm:$0xff]  }
 0x2bc   :  { %v4806_v54 = vpop.eup %4805  ;;  %917 = vmatprep.subr.bf16.mxu1 %v4268_v0 }
 0x2bd   :  { %v554_v55 = vmul.f32 %v4806_v54, %v546_v14  ;;  %v4970_v14 = vmov 0  }
 0x2be   :  { %588 = vrot.lane.b32.xlu1 %v528_v51, %s4967_s23  ;;  %943 = vmatprep.mubr.bf16.mxu1 %v4970_v14 }
 0x2bf   :  { %918 = vmatpush1.bf16.msra.mxu1 %v4266_v1  ;;  %v4282_v1 = vld [vmem:[#allocation7 + $0x3c] ss:$24 sps:$4 sm:$0xff]  }
 0x2c0   :  { %v4808_v56 = vpop.eup %4807  ;;  %919 = vmatprep.subr.bf16.mxu1 %v4271_v2  ;;  %v4280_v2 = vld [vmem:[#allocation7 + $0x38] ss:$24 sps:$4 sm:$0xff]  }
 0x2c1   :  { %v582_v57 = vmul.f32 %v4808_v56, %v574_v17  ;;  %v4317_v17 = vld [vmem:[#allocation8] ss:$24 sps:$4 sm:$0xff]  }
 0x2c2   :  { %592 = vrot.lane.b32.xlu1 %v541_v53, %s4968_s24  ;;  %2806 = vmatpush1.bf16.msra.mxu0 %v4317_v17  ;;  %v4297_v17 = vld [vmem:[#allocation7 + $0x10] ss:$24 sps:$4 sm:$0xff]  }
 0x2c3   :  { %920 = vmatpush1.bf16.msra.mxu1 %v4269_v3  ;;  %2807 = vmatprep.subr.bf16.mxu0 %v4325_v19  ;;  %v4285_v3 = vld [vmem:[#allocation7 + $0x6c] ss:$24 sps:$4 sm:$0xff]   ;;  %v4300_v19 = vld [vmem:[#allocation7 + $0x40] ss:$24 sps:$4 sm:$0xff]  }
 0x2c4   :  { %921 = vmatprep.subr.bf16.mxu1 %v4274_v4  ;;  %v4283_v4 = vld [vmem:[#allocation7 + $0x68] ss:$24 sps:$4 sm:$0xff]  }
 0x2c6   :  { %596 = vrot.lane.b32.xlu1 %v554_v55, %s4956_s12  ;;  %s4971_s12 = smov 80   ;;  %2808 = vmatpush1.bf16.msra.mxu0 %v4323_v20  ;;  %v4305_v20 = vld [vmem:[#allocation7 + $0x74] ss:$24 sps:$4 sm:$0xff]  }
 0x2c7   :  { %922 = vmatpush1.bf16.msra.mxu1 %v4272_v5  ;;  %2809 = vmatprep.subr.bf16.mxu0 %v4331_v21  ;;  %v4288_v5 = vld [vmem:[#allocation7 + $0x9c] ss:$24 sps:$4 sm:$0xff]   ;;  %v4303_v21 = vld [vmem:[#allocation7 + $0x70] ss:$24 sps:$4 sm:$0xff]  }
 0x2c8   :  { %3761 = vmatprep.subr.msk.bf16.mxu1 %vm892_vm7, %v3756_v10  ;;  %v660_v10 = vld [vmem:[#allocation7 + $0x128] sm:$0xff] }
 0x2ca   :  { %604 = vrot.lane.b32.xlu1 %v582_v57, %s4969_s26  ;;  %2810 = vmatpush1.bf16.msra.mxu0 %v4329_v22  ;;  %v4308_v22 = vld [vmem:[#allocation7 + $0xa4] ss:$24 sps:$4 sm:$0xff]  }
 0x2cb   :  { %924 = vmatpush1.bf16.msra.mxu1 %v894_v12  ;;  %2811 = vmatprep.subr.bf16.mxu0 %v4337_v23  ;;  %v3758_v12 = vcombine.high %v660_v10, %v660_v10  ;;  %v4306_v23 = vld [vmem:[#allocation7 + $0xa0] ss:$24 sps:$4 sm:$0xff]  }
 0x2cc   :  { %952 = vmatprep.subr.bf16.mxu1 %v4279_v13  ;;  %v3757_v13 = vcombine.low %v660_v10, %v660_v10 }
 0x2ce   :  { %2812 = vmatpush1.bf16.msra.mxu0 %v4335_v24  ;;  %v4311_v24 = vld [vmem:[#allocation7 + $0xd4] ss:$24 sps:$4 sm:$0xff]  }
 0x2cf   :  { %2813 = vmatprep.subr.bf16.mxu0 %v4343_v25  ;;  %v4309_v25 = vld [vmem:[#allocation7 + $0xd0] ss:$24 sps:$4 sm:$0xff]  }
 0x2d2   :  { %2814 = vmatpush1.bf16.msra.mxu0 %v4341_v26  ;;  %v4314_v26 = vld [vmem:[#allocation7 + $0x104] ss:$24 sps:$4 sm:$0xff]  }
 0x2d3   :  { %2815 = vmatprep.subr.bf16.mxu0 %v4349_v27  ;;  %v661_v27 = vld [vmem:[#allocation7 + $0x130] sm:$0xff] }
 0x2d6   :  { %2816 = vmatpush1.bf16.msra.mxu0 %v4347_v28  ;;  %v4312_v28 = vld [vmem:[#allocation7 + $0x100] ss:$24 sps:$4 sm:$0xff]  }
 0x2d7   :  { %2817 = vmatprep.subr.bf16.mxu0 %v4355_v29  ;;  %v3760_v29 = vcombine.high %v661_v27, %v661_v27 }
 0x2dd   :  { %v585_v53 = vpop.permute.xlu0 %584 }
 0x336   :  { %v563_v6 = vpop.xlane.xlu1 %562 }
 0x337   :  { %v564_v7 = vmul.f32 0.0625, %v563_v6  ;;  %v4286_v6 = vld [vmem:[#allocation7 + $0x98] ss:$24 sps:$4 sm:$0xff]  }
 0x339   :  { %v565_v8 = vadd.f32 1e-05, %v564_v7  ;;  %v4291_v7 = vld [vmem:[#allocation7 + $0xcc] ss:$24 sps:$4 sm:$0xff]  }
 0x33a   :  { %v498_v33 = vpop.xlane.xlu1 %497 }
 0x33b   :  { %4809 = vrsqrt.f32 %v565_v8  ;;  %v499_v37 = vmul.f32 0.0625, %v498_v33  ;;  %v4289_v8 = vld [vmem:[#allocation7 + $0xc8] ss:$24 sps:$4 sm:$0xff]   ;;  %v4328_v33 = vld [vmem:[#allocation8 + $0x3c] ss:$24 sps:$4 sm:$0xff]  }
 0x33d   :  { %v500_v40 = vadd.f32 1e-05, %v499_v37  ;;  %v4332_v37 = vld [vmem:[#allocation8 + $0x68] ss:$24 sps:$4 sm:$0xff]  }
 0x33e   :  { %v589_v47 = vpop.permute.xlu1 %588 }
 0x33f   :  { %4811 = vrsqrt.f32 %v500_v40  ;;  %v4346_v40 = vld [vmem:[#allocation8 + $0xcc] ss:$24 sps:$4 sm:$0xff]  }
 0x342   :  { %v593_v52 = vpop.permute.xlu1 %592 }
 0x345   :  { %v4810_v15 = vpop.eup %4809 }
 0x346   :  { %v567_v16 = vmul.f32 %v4810_v15, %v5113_v30  ;;  %v4353_v30 = vld [vmem:[#allocation8 + $0x120] ss:$24 sps:$4 sm:$0xff]   ;;  %v597_v56 = vpop.permute.xlu1 %596  ;;  %v900_v15 = vsel %vm892_vm7, %v3757_v13, 0 }
 0x347   :  { %2818 = vmatpush1.bf16.msra.mxu0 %v4353_v30 }
 0x348   :  { %600 = vrot.lane.b32.xlu0 %v567_v16, %s4971_s12  ;;  %2819 = vmatprep.subr.bf16.mxu0 %v4361_v31  ;;  %v4299_v16 = vld [vmem:[#allocation7 + $0x14] ss:$24 sps:$4 sm:$0xff]   ;;  %v4322_v31 = vld [vmem:[#allocation8 + $0xc] ss:$24 sps:$4 sm:$0xff]  }
 0x349   :  { %v4812_v49 = vpop.eup %4811 }
 0x34a   :  { %v502_v51 = vmul.f32 %v4812_v49, %v5117_v35  ;;  %v605_v60 = vpop.permute.xlu1 %604  ;;  %v4403_v49 = vld [vmem:[#allocation8 + $0x2a4] ss:$24 sps:$4 sm:$0xff]  }
 0x34b   :  { %2820 = vmatpush1.bf16.msra.mxu0 %v4359_v32  ;;  %v4320_v32 = vld [vmem:[#allocation8 + $0x8] ss:$24 sps:$4 sm:$0xff]  }
 0x34c   :  { %2821 = vmatprep.subr.bf16.mxu0 %v4367_v34  ;;  %v607_v54 = vsel %vm109_vm0, %v502_v51, %v585_v53  ;;  %v4326_v34 = vld [vmem:[#allocation8 + $0x38] ss:$24 sps:$4 sm:$0xff]   ;;  %v4368_v51 = vld [vmem:[#allocation8 + $0x188] ss:$24 sps:$4 sm:$0xff]   ;;  %v4409_v53 = vld [vmem:[#allocation8 + $0x2d4] ss:$24 sps:$4 sm:$0xff]  }
 0x34d   :  { %v608_v55 = vsel %vm414_vm3, %v607_v54, %v589_v47  ;;  %v4362_v47 = vld [vmem:[#allocation8 + $0x158] ss:$24 sps:$4 sm:$0xff]  }
 0x34e   :  { %v610_v57 = vsel %vm609_vm8, %v608_v55, %v593_v52  ;;  %v4376_v52 = vld [vmem:[#allocation8 + $0x1bc] ss:$24 sps:$4 sm:$0xff]   ;;  %v4407_v54 = vld [vmem:[#allocation8 + $0x2d0] ss:$24 sps:$4 sm:$0xff]  }
 0x34f   :  { %2822 = vmatpush1.bf16.msra.mxu0 %v4365_v36  ;;  %v612_v58 = vsel %vm611_vm9, %v610_v57, %v597_v56  ;;  %v4334_v36 = vld [vmem:[#allocation8 + $0x6c] ss:$24 sps:$4 sm:$0xff]   ;;  %v4374_v55 = vld [vmem:[#allocation8 + $0x1b8] ss:$24 sps:$4 sm:$0xff]  }
 0x350   :  { %2823 = vmatprep.subr.bf16.mxu0 %v4373_v38  ;;  %v4340_v38 = vld [vmem:[#allocation8 + $0x9c] ss:$24 sps:$4 sm:$0xff]   ;;  %v4382_v56 = vld [vmem:[#allocation8 + $0x1ec] ss:$24 sps:$4 sm:$0xff]  }
 0x351   :  { %v4415_v57 = vld [vmem:[#allocation8 + $0x304] ss:$24 sps:$4 sm:$0xff]  }
 0x353   :  { %2824 = vmatpush1.bf16.msra.mxu0 %v4371_v39  ;;  %v4338_v39 = vld [vmem:[#allocation8 + $0x98] ss:$24 sps:$4 sm:$0xff]  }
 0x354   :  { %2825 = vmatprep.subr.bf16.mxu0 %v4379_v41  ;;  %v4344_v41 = vld [vmem:[#allocation8 + $0xc8] ss:$24 sps:$4 sm:$0xff]  }
 0x357   :  { %2826 = vmatpush1.bf16.msra.mxu0 %v4377_v42  ;;  %v4352_v42 = vld [vmem:[#allocation8 + $0xfc] ss:$24 sps:$4 sm:$0xff]  }
 0x358   :  { %2827 = vmatprep.subr.bf16.mxu0 %v4385_v43  ;;  %v4350_v43 = vld [vmem:[#allocation8 + $0xf8] ss:$24 sps:$4 sm:$0xff]  }
 0x35b   :  { %2828 = vmatpush1.bf16.msra.mxu0 %v4383_v44  ;;  %v4358_v44 = vld [vmem:[#allocation8 + $0x12c] ss:$24 sps:$4 sm:$0xff]  }
 0x35c   :  { %2829 = vmatprep.subr.bf16.mxu0 %v4391_v45  ;;  %v4356_v45 = vld [vmem:[#allocation8 + $0x128] ss:$24 sps:$4 sm:$0xff]  }
 0x35f   :  { %2830 = vmatpush1.bf16.msra.mxu0 %v4389_v46  ;;  %v4364_v46 = vld [vmem:[#allocation8 + $0x15c] ss:$24 sps:$4 sm:$0xff]  }
 0x360   :  { %2831 = vmatprep.subr.bf16.mxu0 %v4397_v48  ;;  %v4370_v48 = vld [vmem:[#allocation8 + $0x18c] ss:$24 sps:$4 sm:$0xff]  }
 0x363   :  { %2832 = vmatpush1.bf16.msra.mxu0 %v4395_v50  ;;  %v4401_v50 = vld [vmem:[#allocation8 + $0x2a0] ss:$24 sps:$4 sm:$0xff]  }
 0x364   :  { %2833 = vmatprep.subr.bf16.mxu0 %v4403_v49 }
 0x367   :  { %2834 = vmatpush1.bf16.msra.mxu0 %v4401_v50 }
 0x368   :  { %2835 = vmatprep.subr.bf16.mxu0 %v4409_v53  ;;  %v4449_v53 = vld [vmem:[#allocation8 + $0x420] ss:$24 sps:$4 sm:$0xff]  }
 0x36b   :  { %2836 = vmatpush1.bf16.msra.mxu0 %v4407_v54  ;;  %v4452_v54 = vld [vmem:[#allocation8 + $0x428] ss:$24 sps:$4 sm:$0xff]  }
 0x36c   :  { %2846 = vmatprep.subr.bf16.mxu0 %v4415_v57  ;;  %v4460_v57 = vld [vmem:[#allocation8 + $0x45c] ss:$24 sps:$4 sm:$0xff]  }
 0x3ba   :  { %v601_v59 = vpop.permute.xlu0 %600 }
 0x3bb   :  { %v614_v61 = vsel %vm613_vm10, %v612_v58, %v601_v59  ;;  %v4380_v58 = vld [vmem:[#allocation8 + $0x1e8] ss:$24 sps:$4 sm:$0xff]   ;;  %v4388_v59 = vld [vmem:[#allocation8 + $0x21c] ss:$24 sps:$4 sm:$0xff]  }
 0x3bc   :  { %v616_v63 = vsel %vm615_vm11, %v614_v61, %v605_v60  ;;  %v4386_v60 = vld [vmem:[#allocation8 + $0x218] ss:$24 sps:$4 sm:$0xff]   ;;  %v4394_v61 = vld [vmem:[#allocation8 + $0x24c] ss:$24 sps:$4 sm:$0xff]  }
 0x3bd   :  { %v618_v35 = vsel %vm617_vm12, %v616_v63, 0.0  ;;  %v4392_v63 = vld [vmem:[#allocation8 + $0x248] ss:$24 sps:$4 sm:$0xff]  }
 0x3be   :  { %v5132_v0 = vpack.c.bf16 %v618_v35, %v618_v35  ;;  %v4400_v35 = vld [vmem:[#allocation8 + $0x27c] ss:$24 sps:$4 sm:$0xff]  }
 0x3c0   :  { %3762 = vmatmul.mubr.msk.bf16.vlgmr.msra.gmra.mrb[8].mxu1 %vm888_vm13, %v5132_v0 }
 0x3c1   :  { %953 = vmatpush1.bf16.msra.mxu1 %v4277_v62  ;;  %984 = vmatprep.mubr.bf16.mxu1 %v4970_v14  ;;  %v4398_v62 = vld [vmem:[#allocation8 + $0x278] ss:$24 sps:$4 sm:$0xff]  }
 0x3c2   :  { %954 = vmatprep.subr.bf16.mxu1 %v4282_v1  ;;  %v4404_v1 = vld [vmem:[#allocation8 + $0x2a8] ss:$24 sps:$4 sm:$0xff]  }
 0x3c5   :  { %955 = vmatpush1.bf16.msra.mxu1 %v4280_v2  ;;  %v4412_v2 = vld [vmem:[#allocation8 + $0x2dc] ss:$24 sps:$4 sm:$0xff]  }
 0x3c6   :  { %956 = vmatprep.subr.bf16.mxu1 %v4285_v3  ;;  %v4410_v3 = vld [vmem:[#allocation8 + $0x2d8] ss:$24 sps:$4 sm:$0xff]  }
 0x3c9   :  { %957 = vmatpush1.bf16.msra.mxu1 %v4283_v4  ;;  %v4418_v4 = vld [vmem:[#allocation8 + $0x30c] ss:$24 sps:$4 sm:$0xff]  }
 0x3ca   :  { %958 = vmatprep.subr.bf16.mxu1 %v4288_v5  ;;  %v663_v5 = vlaneseq }
 0x3cd   :  { %959 = vmatpush1.bf16.msra.mxu1 %v4286_v6  ;;  %v5146_v6 = vshrl.u32 %v663_v5, 7  ;;  %v4475_v5 = vld [vmem:[#allocation8 + $0x4e4] ss:$24 sps:$4 sm:$0xff]  }
 0x3ce   :  { %960 = vmatprep.subr.bf16.mxu1 %v4291_v7 }
 0x3cf   :  { %v665_v7 = vsub.s32 0, %v5146_v6 }
 0x3d1   :  { %961 = vmatpush1.bf16.msra.mxu1 %v4289_v8  ;;  %v5149_v8 = vld [vmem:[#allocation10] ss:$4 sm:$0x3f] }
 0x3d2   :  { %962 = vmatprep.subr.bf16.mxu1 %v4294_v9  ;;  %v669_v9 = vsub.s32 1, %v5146_v6  ;;  %v666_v10 = vrot.slane %v5149_v8, %v665_v7 }
 0x3d5   :  { %963 = vmatpush1.bf16.msra.mxu1 %v4292_v11  ;;  %v670_v11 = vrot.slane %v5149_v8, %v669_v9 }
 0x3d6   :  { %3763 = vmatprep.subr.msk.bf16.mxu1 %vm892_vm7, %v3758_v12 }
 0x3d9   :  { %965 = vmatpush1.bf16.msra.mxu1 %v900_v15 }
 0x3da   :  { %993 = vmatprep.subr.bf16.mxu1 %v4299_v16 }
 0x3dc   :  { %3764 = vmatmul.mubr.msk.bf16.vlgmr.msra.gmra.mrb[12].mxu1 %vm888_vm13, %v5132_v0 }
 0x3dd   :  { %994 = vmatpush1.bf16.msra.mxu1 %v4297_v17  ;;  %1025 = vmatprep.mubr.bf16.mxu1 %v4970_v14  ;;  %v3759_v14 = vcombine.low %v661_v27, %v661_v27  ;;  %v4419_v27 = vld [vmem:[#allocation8 + $0x330] ss:$24 sps:$4 sm:$0xff]  }
 0x3de   :  { %995 = vmatprep.subr.bf16.mxu1 %v4302_v18 }
 0x3df   :  { %v906_v30 = vsel %vm892_vm7, %v3759_v14, 0  ;;  %v4430_v14 = vld [vmem:[#allocation8 + $0x36c] ss:$24 sps:$4 sm:$0xff]  }
 0x3e1   :  { %996 = vmatpush1.bf16.msra.mxu1 %v4300_v19 }
 0x3e2   :  { %997 = vmatprep.subr.bf16.mxu1 %v4305_v20 }
 0x3e5   :  { %998 = vmatpush1.bf16.msra.mxu1 %v4303_v21 }
 0x3e6   :  { %999 = vmatprep.subr.bf16.mxu1 %v4308_v22  ;;  %v4413_v22 = vld [vmem:[#allocation8 + $0x300] ss:$24 sps:$4 sm:$0xff]  }
 0x3e9   :  { %1000 = vmatpush1.bf16.msra.mxu1 %v4306_v23  ;;  %v4416_v23 = vld [vmem:[#allocation8 + $0x308] ss:$24 sps:$4 sm:$0xff]  }
 0x3ea   :  { %1001 = vmatprep.subr.bf16.mxu1 %v4311_v24 }
 0x3ed   :  { %1002 = vmatpush1.bf16.msra.mxu1 %v4309_v25  ;;  %v4421_v25 = vld [vmem:[#allocation8 + $0x334] ss:$24 sps:$4 sm:$0xff]  }
 0x3ee   :  { %1003 = vmatprep.subr.bf16.mxu1 %v4314_v26  ;;  %v4424_v26 = vld [vmem:[#allocation8 + $0x33c] ss:$24 sps:$4 sm:$0xff]  }
 0x3f1   :  { %1004 = vmatpush1.bf16.msra.mxu1 %v4312_v28  ;;  %v4422_v28 = vld [vmem:[#allocation8 + $0x338] ss:$24 sps:$4 sm:$0xff]  }
 0x3f2   :  { %3765 = vmatprep.subr.msk.bf16.mxu1 %vm892_vm7, %v3760_v29  ;;  %v4427_v29 = vld [vmem:[#allocation8 + $0x364] ss:$24 sps:$4 sm:$0xff]  }
 0x3f5   :  { %1006 = vmatpush1.bf16.msra.mxu1 %v906_v30  ;;  %v4425_v30 = vld [vmem:[#allocation8 + $0x360] ss:$24 sps:$4 sm:$0xff]  }
 0x3f6   :  { %2928 = vmatprep.subr.bf16.mxu1 %v4322_v31  ;;  %v4428_v31 = vld [vmem:[#allocation8 + $0x368] ss:$24 sps:$4 sm:$0xff]  }
 0x3f8   :  { %3766 = vmatmul.mubr.msk.bf16.vlgmr.msra.gmra.mrb[16].mxu1 %vm888_vm13, %v5132_v0  ;;  %v4406_v0 = vld [vmem:[#allocation8 + $0x2ac] ss:$24 sps:$4 sm:$0xff]  }
 0x3f9   :  { %2929 = vmatpush1.bf16.msra.mxu1 %v4320_v32  ;;  %v4433_v32 = vld [vmem:[#allocation8 + $0x394] ss:$24 sps:$4 sm:$0xff]  }
 0x3fa   :  { %2930 = vmatprep.subr.bf16.mxu1 %v4328_v33  ;;  %v4436_v33 = vld [vmem:[#allocation8 + $0x39c] ss:$24 sps:$4 sm:$0xff]  }
 0x3fd   :  { %2931 = vmatpush1.bf16.msra.mxu1 %v4326_v34  ;;  %v4431_v34 = vld [vmem:[#allocation8 + $0x390] ss:$24 sps:$4 sm:$0xff]  }
 0x3fe   :  { %2932 = vmatprep.subr.bf16.mxu1 %v4334_v36  ;;  %v4434_v36 = vld [vmem:[#allocation8 + $0x398] ss:$24 sps:$4 sm:$0xff]  }
 0x401   :  { %2933 = vmatpush1.bf16.msra.mxu1 %v4332_v37  ;;  %v4439_v37 = vld [vmem:[#allocation8 + $0x3c4] ss:$24 sps:$4 sm:$0xff]  }
 0x402   :  { %2934 = vmatprep.subr.bf16.mxu1 %v4340_v38  ;;  %v4442_v38 = vld [vmem:[#allocation8 + $0x3cc] ss:$24 sps:$4 sm:$0xff]  }
 0x405   :  { %2935 = vmatpush1.bf16.msra.mxu1 %v4338_v39  ;;  %v4437_v39 = vld [vmem:[#allocation8 + $0x3c0] ss:$24 sps:$4 sm:$0xff]  }
 0x406   :  { %2936 = vmatprep.subr.bf16.mxu1 %v4346_v40  ;;  %v4440_v40 = vld [vmem:[#allocation8 + $0x3c8] ss:$24 sps:$4 sm:$0xff]  }
 0x409   :  { %2937 = vmatpush1.bf16.msra.mxu1 %v4344_v41  ;;  %v677_v41 = vsub.s32 3, %v5146_v6 }
 0x40a   :  { %2938 = vmatprep.subr.bf16.mxu1 %v4352_v42  ;;  %v4445_v42 = vld [vmem:[#allocation8 + $0x3f4] ss:$24 sps:$4 sm:$0xff]  }
 0x40d   :  { %2939 = vmatpush1.bf16.msra.mxu1 %v4350_v43  ;;  %v4448_v43 = vld [vmem:[#allocation8 + $0x3fc] ss:$24 sps:$4 sm:$0xff]  }
 0x40e   :  { %2940 = vmatprep.subr.bf16.mxu1 %v4358_v44  ;;  %v678_v44 = vrot.slane %v5149_v8, %v677_v41 }
 0x411   :  { %2941 = vmatpush1.bf16.msra.mxu1 %v4356_v45  ;;  %v4443_v45 = vld [vmem:[#allocation8 + $0x3f0] ss:$24 sps:$4 sm:$0xff]  }
 0x412   :  { %2942 = vmatprep.subr.bf16.mxu1 %v4364_v46  ;;  %v4446_v46 = vld [vmem:[#allocation8 + $0x3f8] ss:$24 sps:$4 sm:$0xff]  }
 0x415   :  { %2943 = vmatpush1.bf16.msra.mxu1 %v4362_v47  ;;  %v4451_v47 = vld [vmem:[#allocation8 + $0x424] ss:$24 sps:$4 sm:$0xff]  }
 0x416   :  { %2944 = vmatprep.subr.bf16.mxu1 %v4370_v48  ;;  %v4454_v48 = vld [vmem:[#allocation8 + $0x42c] ss:$24 sps:$4 sm:$0xff]  }
 0x419   :  { %2945 = vmatpush1.bf16.msra.mxu1 %v4368_v51 }
 0x41a   :  { %2946 = vmatprep.subr.bf16.mxu1 %v4376_v52 }
 0x41d   :  { %2947 = vmatpush1.bf16.msra.mxu1 %v4374_v55 }
 0x41e   :  { %2948 = vmatprep.subr.bf16.mxu1 %v4382_v56  ;;  %v4457_v56 = vld [vmem:[#allocation8 + $0x454] ss:$24 sps:$4 sm:$0xff]  }
 0x421   :  { %2949 = vmatpush1.bf16.msra.mxu1 %v4380_v58 }
 0x422   :  { %2950 = vmatprep.subr.bf16.mxu1 %v4388_v59 }
 0x425   :  { %2951 = vmatpush1.bf16.msra.mxu1 %v4386_v60  ;;  %v4455_v60 = vld [vmem:[#allocation8 + $0x450] ss:$24 sps:$4 sm:$0xff]  }
 0x426   :  { %2952 = vmatprep.subr.bf16.mxu1 %v4394_v61  ;;  %v4458_v61 = vld [vmem:[#allocation8 + $0x458] ss:$24 sps:$4 sm:$0xff]  }
 0x429   :  { %2953 = vmatpush1.bf16.msra.mxu1 %v4392_v63  ;;  %v4463_v63 = vld [vmem:[#allocation8 + $0x484] ss:$24 sps:$4 sm:$0xff]  }
 0x42a   :  { %2954 = vmatprep.subr.bf16.mxu1 %v4400_v35  ;;  %v4466_v35 = vld [vmem:[#allocation8 + $0x48c] ss:$24 sps:$4 sm:$0xff]  }
 0x42d   :  { %2955 = vmatpush1.bf16.msra.mxu1 %v4398_v62  ;;  %v4461_v62 = vld [vmem:[#allocation8 + $0x480] ss:$24 sps:$4 sm:$0xff]  }
 0x42e   :  { %2956 = vmatprep.subr.bf16.mxu1 %v4406_v0  ;;  %v4464_v0 = vld [vmem:[#allocation8 + $0x488] ss:$24 sps:$4 sm:$0xff]  }
 0x431   :  { %2957 = vmatpush1.bf16.msra.mxu1 %v4404_v1  ;;  %v4469_v1 = vld [vmem:[#allocation8 + $0x4b4] ss:$24 sps:$4 sm:$0xff]  }
 0x432   :  { %2958 = vmatprep.subr.bf16.mxu1 %v4412_v2  ;;  %v4472_v2 = vld [vmem:[#allocation8 + $0x4bc] ss:$24 sps:$4 sm:$0xff]  }
 0x435   :  { %2959 = vmatpush1.bf16.msra.mxu1 %v4410_v3  ;;  %v4467_v3 = vld [vmem:[#allocation8 + $0x4b0] ss:$24 sps:$4 sm:$0xff]  }
 0x436   :  { %2969 = vmatprep.subr.bf16.mxu1 %v4418_v4  ;;  %v4470_v4 = vld [vmem:[#allocation8 + $0x4b8] ss:$24 sps:$4 sm:$0xff]  }
 0x493   :  { %v945_v12 = vpop.f32.mrb[8].mxu1 }
 0x494   :  { %v946_v13 = vadd.f32 %v945_v12, %v666_v10  ;;  %v947_v15 = vpop.f32.mrb[9].mxu1  ;;  %v4478_v10 = vld [vmem:[#allocation8 + $0x4ec] ss:$24 sps:$4 sm:$0xff]   ;;  %v4476_v12 = vld [vmem:[#allocation8 + $0x4e8] ss:$24 sps:$4 sm:$0xff]  }
 0x495   :  { %v948_v16 = vadd.f32 %v947_v15, %v670_v11  ;;  %v949_v17 = vpop.f32.mrb[10].mxu1  ;;  %v4473_v11 = vld [vmem:[#allocation8 + $0x4e0] ss:$24 sps:$4 sm:$0xff]   ;;  %v4484_v15 = vld [vmem:[#allocation8 + $0x51c] ss:$24 sps:$4 sm:$0xff]  }
 0x496   :  { %v1034_v18 = vmax.f32 %v946_v13, 0.0  ;;  %v950_v19 = vpop.f32.mrb[11].mxu1  ;;  %v4481_v13 = vld [vmem:[#allocation8 + $0x514] ss:$24 sps:$4 sm:$0xff]   ;;  %v4482_v17 = vld [vmem:[#allocation8 + $0x518] ss:$24 sps:$4 sm:$0xff]  }
 0x497   :  { %v1035_v20 = vmax.f32 %v948_v16, 0.0  ;;  %v4479_v16 = vld [vmem:[#allocation8 + $0x510] ss:$24 sps:$4 sm:$0xff]   ;;  %v4490_v19 = vld [vmem:[#allocation8 + $0x54c] ss:$24 sps:$4 sm:$0xff]  }
 0x498   :  { %v5160_v24 = vpack.c.bf16 %v1034_v18, %v1034_v18  ;;  %v4487_v18 = vld [vmem:[#allocation8 + $0x544] ss:$24 sps:$4 sm:$0xff]  }
 0x499   :  { %v5158_v21 = vpack.c.bf16 %v1035_v20, %v1035_v20  ;;  %v4485_v20 = vld [vmem:[#allocation8 + $0x540] ss:$24 sps:$4 sm:$0xff]  }
 0x49b   :  { %2837 = vmatprep.mubr.bf16.mxu0 %v5158_v21  ;;  %2960 = vmatprep.mubr.bf16.mxu1 %v5158_v21 }
 0x49c   :  { %2838 = vmatmul.mubr.bf16.vlgmr.msra.gmra.mrb[4].mxu0 %v5160_v24  ;;  %2961 = vmatmul.mubr.bf16.vlgmr.msra.gmra.mrb[20].mxu1 %v5160_v24 }
 0x49d   :  { %2847 = vmatpush1.bf16.msra.mxu0 %v4413_v22  ;;  %2970 = vmatpush1.bf16.msra.mxu1 %v4416_v23  ;;  %v4488_v22 = vld [vmem:[#allocation8 + $0x548] ss:$24 sps:$4 sm:$0xff]   ;;  %v673_v23 = vsub.s32 2, %v5146_v6 }
 0x49e   :  { %2848 = vmatprep.subr.bf16.mxu0 %v4421_v25  ;;  %2971 = vmatprep.subr.bf16.mxu1 %v4424_v26  ;;  %v4493_v25 = vld [vmem:[#allocation8 + $0x574] ss:$24 sps:$4 sm:$0xff]  }
 0x49f   :  { %v4496_v26 = vld [vmem:[#allocation8 + $0x57c] ss:$24 sps:$4 sm:$0xff]  }
 0x4a1   :  { %2849 = vmatpush1.bf16.msra.mxu0 %v4419_v27  ;;  %2972 = vmatpush1.bf16.msra.mxu1 %v4422_v28  ;;  %v685_v28 = vsub.s32 5, %v5146_v6 }
 0x4a2   :  { %2850 = vmatprep.subr.bf16.mxu0 %v4427_v29  ;;  %2973 = vmatprep.subr.bf16.mxu1 %v4430_v14 }
 0x4a5   :  { %2851 = vmatpush1.bf16.msra.mxu0 %v4425_v30  ;;  %2974 = vmatpush1.bf16.msra.mxu1 %v4428_v31  ;;  %v4491_v30 = vld [vmem:[#allocation8 + $0x570] ss:$24 sps:$4 sm:$0xff]  }
 0x4a6   :  { %2852 = vmatprep.subr.bf16.mxu0 %v4433_v32  ;;  %2975 = vmatprep.subr.bf16.mxu1 %v4436_v33  ;;  %v4494_v31 = vld [vmem:[#allocation8 + $0x578] ss:$24 sps:$4 sm:$0xff]   ;;  %v674_v32 = vrot.slane %v5149_v8, %v673_v23 }
 0x4a9   :  { %2853 = vmatpush1.bf16.msra.mxu0 %v4431_v34  ;;  %2976 = vmatpush1.bf16.msra.mxu1 %v4434_v36  ;;  %v4499_v34 = vld [vmem:[#allocation8 + $0x5a4] ss:$24 sps:$4 sm:$0xff]  }
 0x4aa   :  { %2854 = vmatprep.subr.bf16.mxu0 %v4439_v37  ;;  %2977 = vmatprep.subr.bf16.mxu1 %v4442_v38  ;;  %v4502_v36 = vld [vmem:[#allocation8 + $0x5ac] ss:$24 sps:$4 sm:$0xff]   ;;  %v686_v37 = vrot.slane %v5149_v8, %v685_v28  ;;  %v4497_v38 = vld [vmem:[#allocation8 + $0x5a0] ss:$24 sps:$4 sm:$0xff]  }
 0x4ad   :  { %2855 = vmatpush1.bf16.msra.mxu0 %v4437_v39  ;;  %2978 = vmatpush1.bf16.msra.mxu1 %v4440_v40  ;;  %v4500_v39 = vld [vmem:[#allocation8 + $0x5a8] ss:$24 sps:$4 sm:$0xff]  }
 0x4ae   :  { %2856 = vmatprep.subr.bf16.mxu0 %v4445_v42  ;;  %2979 = vmatprep.subr.bf16.mxu1 %v4448_v43  ;;  %v4505_v42 = vld [vmem:[#allocation8 + $0x5d4] ss:$24 sps:$4 sm:$0xff]  }
 0x4af   :  { %v5170_v49 = vpop.f32.mrb[12].mxu1  ;;  %v4508_v43 = vld [vmem:[#allocation8 + $0x5dc] ss:$24 sps:$4 sm:$0xff]  }
 0x4b0   :  { %v988_v50 = vpop.f32.mrb[13].mxu1  ;;  %v987_v40 = vadd.f32 %v5170_v49, %v674_v32  ;;  %v4512_v49 = vld [vmem:[#allocation8 + $0x608] ss:$24 sps:$4 sm:$0xff]   ;;  %v4565_v32 = vld [vmem:[#allocation8 + $0x7b4] ss:$24 sps:$4 sm:$0xff]  }
 0x4b1   :  { %v989_v51 = vadd.f32 %v988_v50, %v678_v44  ;;  %v990_v52 = vpop.f32.mrb[14].mxu1  ;;  %2857 = vmatpush1.bf16.msra.mxu0 %v4443_v45  ;;  %2980 = vmatpush1.bf16.msra.mxu1 %v4446_v46  ;;  %v4503_v45 = vld [vmem:[#allocation8 + $0x5d0] ss:$24 sps:$4 sm:$0xff]   ;;  %v4514_v50 = vld [vmem:[#allocation8 + $0x60c] ss:$24 sps:$4 sm:$0xff]  }
 0x4b2   :  { %v991_v55 = vpop.f32.mrb[15].mxu1  ;;  %2858 = vmatprep.subr.bf16.mxu0 %v4451_v47  ;;  %2981 = vmatprep.subr.bf16.mxu1 %v4454_v48  ;;  %v4506_v46 = vld [vmem:[#allocation8 + $0x5d8] ss:$24 sps:$4 sm:$0xff]   ;;  %v1036_v47 = vmax.f32 %v987_v40, 0.0  ;;  %v4511_v48 = vld [vmem:[#allocation8 + $0x604] ss:$24 sps:$4 sm:$0xff]  }
 0x4b3   :  { %v1037_v58 = vmax.f32 %v989_v51, 0.0  ;;  %v4509_v52 = vld [vmem:[#allocation8 + $0x600] ss:$24 sps:$4 sm:$0xff]   ;;  %v4517_v55 = vld [vmem:[#allocation8 + $0x634] ss:$24 sps:$4 sm:$0xff]  }
 0x4b4   :  { %v4572_v40 = vld [vmem:[#allocation8 + $0x7e8] ss:$24 sps:$4 sm:$0xff]  }
 0x4b5   :  { %v5172_v59 = vpack.c.bf16 %v1037_v58, %v1037_v58  ;;  %2859 = vmatpush1.bf16.msra.mxu0 %v4449_v53  ;;  %2982 = vmatpush1.bf16.msra.mxu1 %v4452_v54  ;;  %v5187_v53 = vpack.c.bf16 %v1036_v47, %v1036_v47  ;;  %v4518_v58 = vld [vmem:[#allocation8 + $0x638] ss:$24 sps:$4 sm:$0xff]   ;;  %v4586_v47 = vld [vmem:[#allocation8 + $0x84c] ss:$24 sps:$4 sm:$0xff]  }
 0x4b6   :  { %2860 = vmatprep.subr.bf16.mxu0 %v4457_v56  ;;  %2983 = vmatprep.subr.bf16.mxu1 %v4460_v57  ;;  %v4520_v56 = vld [vmem:[#allocation8 + $0x63c] ss:$24 sps:$4 sm:$0xff]   ;;  %v4515_v57 = vld [vmem:[#allocation8 + $0x630] ss:$24 sps:$4 sm:$0xff]  }
 0x4b7   :  { %2878 = vmatprep.mubr.bf16.mxu0 %v5172_v59  ;;  %3001 = vmatprep.mubr.bf16.mxu1 %v5172_v59 }
 0x4b9   :  { %2861 = vmatpush1.bf16.msra.mxu0 %v4455_v60  ;;  %2984 = vmatpush1.bf16.msra.mxu1 %v4458_v61  ;;  %v4523_v60 = vld [vmem:[#allocation8 + $0x664] ss:$24 sps:$4 sm:$0xff]  }
 0x4ba   :  { %2862 = vmatprep.subr.bf16.mxu0 %v4463_v63  ;;  %2985 = vmatprep.subr.bf16.mxu1 %v4466_v35  ;;  %v4526_v61 = vld [vmem:[#allocation8 + $0x66c] ss:$24 sps:$4 sm:$0xff]   ;;  %v4521_v63 = vld [vmem:[#allocation8 + $0x660] ss:$24 sps:$4 sm:$0xff]  }
 0x4bb   :  { %v4524_v35 = vld [vmem:[#allocation8 + $0x668] ss:$24 sps:$4 sm:$0xff]  }
 0x4bd   :  { %2863 = vmatpush1.bf16.msra.mxu0 %v4461_v62  ;;  %2986 = vmatpush1.bf16.msra.mxu1 %v4464_v0  ;;  %v4529_v62 = vld [vmem:[#allocation8 + $0x694] ss:$24 sps:$4 sm:$0xff]  }
 0x4be   :  { %2864 = vmatprep.subr.bf16.mxu0 %v4469_v1  ;;  %2987 = vmatprep.subr.bf16.mxu1 %v4472_v2  ;;  %v4532_v0 = vld [vmem:[#allocation8 + $0x69c] ss:$24 sps:$4 sm:$0xff]   ;;  %v4527_v1 = vld [vmem:[#allocation8 + $0x690] ss:$24 sps:$4 sm:$0xff]  }
 0x4bf   :  { %v4530_v2 = vld [vmem:[#allocation8 + $0x698] ss:$24 sps:$4 sm:$0xff]  }
 0x4c1   :  { %2865 = vmatpush1.bf16.msra.mxu0 %v4467_v3  ;;  %2988 = vmatpush1.bf16.msra.mxu1 %v4470_v4  ;;  %v4535_v3 = vld [vmem:[#allocation8 + $0x6c4] ss:$24 sps:$4 sm:$0xff]  }
 0x4c2   :  { %2866 = vmatprep.subr.bf16.mxu0 %v4475_v5  ;;  %2989 = vmatprep.subr.bf16.mxu1 %v4478_v10  ;;  %v4538_v4 = vld [vmem:[#allocation8 + $0x6cc] ss:$24 sps:$4 sm:$0xff]   ;;  %v4533_v5 = vld [vmem:[#allocation8 + $0x6c0] ss:$24 sps:$4 sm:$0xff]  }
 0x4c3   :  { %v4536_v10 = vld [vmem:[#allocation8 + $0x6c8] ss:$24 sps:$4 sm:$0xff]  }
 0x4c5   :  { %2867 = vmatpush1.bf16.msra.mxu0 %v4473_v11  ;;  %2990 = vmatpush1.bf16.msra.mxu1 %v4476_v12  ;;  %v4541_v11 = vld [vmem:[#allocation8 + $0x6f4] ss:$24 sps:$4 sm:$0xff]  }
 0x4c6   :  { %2868 = vmatprep.subr.bf16.mxu0 %v4481_v13  ;;  %2991 = vmatprep.subr.bf16.mxu1 %v4484_v15  ;;  %v4544_v12 = vld [vmem:[#allocation8 + $0x6fc] ss:$24 sps:$4 sm:$0xff]   ;;  %v4539_v13 = vld [vmem:[#allocation8 + $0x6f0] ss:$24 sps:$4 sm:$0xff]  }
 0x4c7   :  { %v4542_v15 = vld [vmem:[#allocation8 + $0x6f8] ss:$24 sps:$4 sm:$0xff]  }
 0x4c9   :  { %2869 = vmatpush1.bf16.msra.mxu0 %v4479_v16  ;;  %2992 = vmatpush1.bf16.msra.mxu1 %v4482_v17  ;;  %v4547_v16 = vld [vmem:[#allocation8 + $0x724] ss:$24 sps:$4 sm:$0xff]  }
 0x4ca   :  { %2870 = vmatprep.subr.bf16.mxu0 %v4487_v18  ;;  %2993 = vmatprep.subr.bf16.mxu1 %v4490_v19  ;;  %v4550_v17 = vld [vmem:[#allocation8 + $0x72c] ss:$24 sps:$4 sm:$0xff]   ;;  %v4545_v18 = vld [vmem:[#allocation8 + $0x720] ss:$24 sps:$4 sm:$0xff]  }
 0x4cb   :  { %v5177_v27 = vpop.f32.mrb[16].mxu1  ;;  %v4548_v19 = vld [vmem:[#allocation8 + $0x728] ss:$24 sps:$4 sm:$0xff]  }
 0x4cc   :  { %v1029_v29 = vpop.f32.mrb[17].mxu1 }
 0x4cd   :  { %v1031_v14 = vpop.f32.mrb[18].mxu1  ;;  %2871 = vmatpush1.bf16.msra.mxu0 %v4485_v20  ;;  %2994 = vmatpush1.bf16.msra.mxu1 %v4488_v22  ;;  %v1030_v44 = vadd.f32 %v1029_v29, %v686_v37  ;;  %v4553_v20 = vld [vmem:[#allocation8 + $0x754] ss:$24 sps:$4 sm:$0xff]   ;;  %v4559_v29 = vld [vmem:[#allocation8 + $0x784] ss:$24 sps:$4 sm:$0xff]  }
 0x4ce   :  { %v1032_v33 = vpop.f32.mrb[19].mxu1  ;;  %2872 = vmatprep.subr.bf16.mxu0 %v4493_v25  ;;  %2995 = vmatprep.subr.bf16.mxu1 %v4496_v26  ;;  %v4556_v22 = vld [vmem:[#allocation8 + $0x75c] ss:$24 sps:$4 sm:$0xff]   ;;  %v4551_v25 = vld [vmem:[#allocation8 + $0x750] ss:$24 sps:$4 sm:$0xff]  }
 0x4cf   :  { %v1039_v51 = vmax.f32 %v1030_v44, 0.0  ;;  %v4554_v26 = vld [vmem:[#allocation8 + $0x758] ss:$24 sps:$4 sm:$0xff]   ;;  %v4562_v14 = vld [vmem:[#allocation8 + $0x78c] ss:$24 sps:$4 sm:$0xff]  }
 0x4d0   :  { %v4568_v33 = vld [vmem:[#allocation8 + $0x7bc] ss:$24 sps:$4 sm:$0xff]   ;;  %v4575_v44 = vld [vmem:[#allocation8 + $0x810] ss:$24 sps:$4 sm:$0xff]  }
 0x4d1   :  { %2873 = vmatpush1.bf16.msra.mxu0 %v4491_v30  ;;  %2996 = vmatpush1.bf16.msra.mxu1 %v4494_v31  ;;  %v5189_v54 = vpack.c.bf16 %v1039_v51, %v1039_v51  ;;  %v4557_v30 = vld [vmem:[#allocation8 + $0x780] ss:$24 sps:$4 sm:$0xff]   ;;  %v4571_v37 = vld [vmem:[#allocation8 + $0x7e4] ss:$24 sps:$4 sm:$0xff]  }
 0x4d2   :  { %2874 = vmatprep.subr.bf16.mxu0 %v4499_v34  ;;  %2997 = vmatprep.subr.bf16.mxu1 %v4502_v36  ;;  %v4560_v31 = vld [vmem:[#allocation8 + $0x788] ss:$24 sps:$4 sm:$0xff]   ;;  %v4566_v36 = vld [vmem:[#allocation8 + $0x7b8] ss:$24 sps:$4 sm:$0xff]  }
 0x4d3   :  { %v4563_v34 = vld [vmem:[#allocation8 + $0x7b0] ss:$24 sps:$4 sm:$0xff]  }
 0x4d4   :  { %v4584_v51 = vld [vmem:[#allocation8 + $0x848] ss:$24 sps:$4 sm:$0xff]  }
 0x4d5   :  { %2875 = vmatpush1.bf16.msra.mxu0 %v4497_v38  ;;  %2998 = vmatpush1.bf16.msra.mxu1 %v4500_v39  ;;  %v4574_v38 = vld [vmem:[#allocation8 + $0x7ec] ss:$24 sps:$4 sm:$0xff]   ;;  %v4569_v39 = vld [vmem:[#allocation8 + $0x7e0] ss:$24 sps:$4 sm:$0xff]  }
 0x4d6   :  { %2876 = vmatprep.subr.bf16.mxu0 %v4505_v42  ;;  %2999 = vmatprep.subr.bf16.mxu1 %v4508_v43  ;;  %v4577_v42 = vld [vmem:[#allocation8 + $0x814] ss:$24 sps:$4 sm:$0xff]  }
 0x4d7   :  { %v4580_v43 = vld [vmem:[#allocation8 + $0x81c] ss:$24 sps:$4 sm:$0xff]  }
 0x4d9   :  { %2877 = vmatpush1.bf16.msra.mxu0 %v4503_v45  ;;  %3000 = vmatpush1.bf16.msra.mxu1 %v4506_v46  ;;  %v4578_v45 = vld [vmem:[#allocation8 + $0x818] ss:$24 sps:$4 sm:$0xff]   ;;  %v4583_v46 = vld [vmem:[#allocation8 + $0x844] ss:$24 sps:$4 sm:$0xff]  }
 0x4da   :  { %2887 = vmatprep.subr.bf16.mxu0 %v4511_v48  ;;  %3010 = vmatprep.subr.bf16.mxu1 %v4514_v50  ;;  %v4581_v48 = vld [vmem:[#allocation8 + $0x840] ss:$24 sps:$4 sm:$0xff]   ;;  %v681_v50 = vsub.s32 4, %v5146_v6 }
 0x4db   :  { %v4055_v6 = vld [vmem:[#allocation10 + $0x2] ss:$0 sm:$0xff] }
 0x4dc   :  { %2879 = vmatmul.mubr.bf16.vlgmr.msra.gmra.mrb[4].mxu0 %v5187_v53  ;;  %3002 = vmatmul.mubr.bf16.vlgmr.msra.gmra.mrb[20].mxu1 %v5187_v53 }
 0x4dd   :  { %2888 = vmatpush1.bf16.msra.mxu0 %v4509_v52  ;;  %2919 = vmatprep.mubr.bf16.mxu0 %v5189_v54  ;;  %v4589_v52 = vld [vmem:[#allocation8 + $0x874] ss:$24 sps:$4 sm:$0xff]  }
 0x4de   :  { %3011 = vmatpush1.bf16.msra.mxu1 %v4512_v49  ;;  %3042 = vmatprep.mubr.bf16.mxu1 %v5189_v54  ;;  %v4592_v49 = vld [vmem:[#allocation8 + $0x87c] ss:$24 sps:$4 sm:$0xff]  }
 0x4df   :  { %2889 = vmatprep.subr.bf16.mxu0 %v4517_v55  ;;  %3012 = vmatprep.subr.bf16.mxu1 %v4520_v56  ;;  %v4587_v55 = vld [vmem:[#allocation8 + $0x870] ss:$24 sps:$4 sm:$0xff]   ;;  %v682_v56 = vrot.slane %v5149_v8, %v681_v50 }
 0x4e0   :  { %v4602_v8 = vld [vmem:[#allocation8 + $0x8d8] ss:$24 sps:$4 sm:$0xff]  }
 0x4e1   :  { %2890 = vmatpush1.bf16.msra.mxu0 %v4515_v57  ;;  %v4590_v57 = vld [vmem:[#allocation8 + $0x878] ss:$24 sps:$4 sm:$0xff]  }
 0x4e2   :  { %3013 = vmatpush1.bf16.msra.mxu1 %v4518_v58  ;;  %2891 = vmatprep.subr.bf16.mxu0 %v4523_v60  ;;  %v4595_v58 = vld [vmem:[#allocation8 + $0x8a4] ss:$24 sps:$4 sm:$0xff]  }
 0x4e3   :  { %3014 = vmatprep.subr.bf16.mxu1 %v4526_v61  ;;  %v4598_v60 = vld [vmem:[#allocation8 + $0x8ac] ss:$24 sps:$4 sm:$0xff]   ;;  %v4593_v61 = vld [vmem:[#allocation8 + $0x8a0] ss:$24 sps:$4 sm:$0xff]  }
 0x4e5   :  { %2892 = vmatpush1.bf16.msra.mxu0 %v4521_v63  ;;  %v1028_v63 = vadd.f32 %v5177_v27, %v682_v56  ;;  %v4610_v27 = vld [vmem:[#allocation8 + $0x44] ss:$24 sps:$4 sm:$0xff]   ;;  %v4656_v56 = vld [vmem:[#allocation8 + $0x340] ss:$24 sps:$4 sm:$0xff]  }
 0x4e6   :  { %3015 = vmatpush1.bf16.msra.mxu1 %v4524_v35  ;;  %2893 = vmatprep.subr.bf16.mxu0 %v4529_v62  ;;  %v4596_v35 = vld [vmem:[#allocation8 + $0x8a8] ss:$24 sps:$4 sm:$0xff]   ;;  %v4601_v62 = vld [vmem:[#allocation8 + $0x8d4] ss:$24 sps:$4 sm:$0xff]  }
 0x4e7   :  { %3016 = vmatprep.subr.bf16.mxu1 %v4532_v0  ;;  %v4604_v0 = vld [vmem:[#allocation8 + $0x8dc] ss:$24 sps:$4 sm:$0xff]  }
 0x4e9   :  { %2894 = vmatpush1.bf16.msra.mxu0 %v4527_v1  ;;  %v4599_v1 = vld [vmem:[#allocation8 + $0x8d0] ss:$24 sps:$4 sm:$0xff]  }
 0x4ea   :  { %3017 = vmatpush1.bf16.msra.mxu1 %v4530_v2  ;;  %2895 = vmatprep.subr.bf16.mxu0 %v4535_v3  ;;  %v1038_v2 = vmax.f32 %v1028_v63, 0.0  ;;  %v4607_v3 = vld [vmem:[#allocation8 + $0x14] ss:$24 sps:$4 sm:$0xff]  }
 0x4eb   :  { %3018 = vmatprep.subr.bf16.mxu1 %v4538_v4  ;;  %v4605_v4 = vld [vmem:[#allocation8 + $0x10] ss:$24 sps:$4 sm:$0xff]  }
 0x4ec   :  { %v4757_v63 = vld [vmem:[%s5391_s5 + $0x60] sm:$0xff]  }
 0x4ed   :  { %2896 = vmatpush1.bf16.msra.mxu0 %v4533_v5  ;;  %v5200_v5 = vpack.c.bf16 %v1038_v2, %v1038_v2  ;;  %v4665_v2 = vld [vmem:[#allocation8 + $0x3d0] ss:$24 sps:$4 sm:$0xff]  }
 0x4ee   :  { %3019 = vmatpush1.bf16.msra.mxu1 %v4536_v10  ;;  %2897 = vmatprep.subr.bf16.mxu0 %v4541_v11  ;;  %v4608_v10 = vld [vmem:[#allocation8 + $0x40] ss:$24 sps:$4 sm:$0xff]   ;;  %v4613_v11 = vld [vmem:[#allocation8 + $0x74] ss:$24 sps:$4 sm:$0xff]  }
 0x4ef   :  { %3020 = vmatprep.subr.bf16.mxu1 %v4544_v12  ;;  %v4611_v12 = vld [vmem:[#allocation8 + $0x70] ss:$24 sps:$4 sm:$0xff]  }
 0x4f1   :  { %2898 = vmatpush1.bf16.msra.mxu0 %v4539_v13  ;;  %v4616_v13 = vld [vmem:[#allocation8 + $0xa4] ss:$24 sps:$4 sm:$0xff]  }
 0x4f2   :  { %3021 = vmatpush1.bf16.msra.mxu1 %v4542_v15  ;;  %2899 = vmatprep.subr.bf16.mxu0 %v4547_v16  ;;  %v4614_v15 = vld [vmem:[#allocation8 + $0xa0] ss:$24 sps:$4 sm:$0xff]   ;;  %v4619_v16 = vld [vmem:[#allocation8 + $0xd4] ss:$24 sps:$4 sm:$0xff]  }
 0x4f3   :  { %3022 = vmatprep.subr.bf16.mxu1 %v4550_v17  ;;  %v4617_v17 = vld [vmem:[#allocation8 + $0xd0] ss:$24 sps:$4 sm:$0xff]  }
 0x4f5   :  { %2900 = vmatpush1.bf16.msra.mxu0 %v4545_v18  ;;  %v4622_v18 = vld [vmem:[#allocation8 + $0x104] ss:$24 sps:$4 sm:$0xff]  }
 0x4f6   :  { %3023 = vmatpush1.bf16.msra.mxu1 %v4548_v19  ;;  %2901 = vmatprep.subr.bf16.mxu0 %v4553_v20  ;;  %v4620_v19 = vld [vmem:[#allocation8 + $0x100] ss:$24 sps:$4 sm:$0xff]   ;;  %v4625_v20 = vld [vmem:[#allocation8 + $0x134] ss:$24 sps:$4 sm:$0xff]  }
 0x4f7   :  { %3024 = vmatprep.subr.bf16.mxu1 %v4556_v22  ;;  %v4628_v22 = vld [vmem:[#allocation8 + $0x164] ss:$24 sps:$4 sm:$0xff]  }
 0x4f9   :  { %2902 = vmatpush1.bf16.msra.mxu0 %v4551_v25  ;;  %v4626_v25 = vld [vmem:[#allocation8 + $0x160] ss:$24 sps:$4 sm:$0xff]  }
 0x4fa   :  { %3025 = vmatpush1.bf16.msra.mxu1 %v4554_v26  ;;  %2903 = vmatprep.subr.bf16.mxu0 %v4559_v29  ;;  %v4631_v26 = vld [vmem:[#allocation8 + $0x194] ss:$24 sps:$4 sm:$0xff]   ;;  %v4629_v29 = vld [vmem:[#allocation8 + $0x190] ss:$24 sps:$4 sm:$0xff]  }
 0x4fb   :  { %3026 = vmatprep.subr.bf16.mxu1 %v4562_v14  ;;  %v4634_v14 = vld [vmem:[#allocation8 + $0x1c4] ss:$24 sps:$4 sm:$0xff]  }
 0x4fd   :  { %2904 = vmatpush1.bf16.msra.mxu0 %v4557_v30  ;;  %v4632_v30 = vld [vmem:[#allocation8 + $0x1c0] ss:$24 sps:$4 sm:$0xff]  }
 0x4fe   :  { %3027 = vmatpush1.bf16.msra.mxu1 %v4560_v31  ;;  %2905 = vmatprep.subr.bf16.mxu0 %v4565_v32  ;;  %v4637_v31 = vld [vmem:[#allocation8 + $0x1f4] ss:$24 sps:$4 sm:$0xff]   ;;  %v4635_v32 = vld [vmem:[#allocation8 + $0x1f0] ss:$24 sps:$4 sm:$0xff]  }
 0x4ff   :  { %3028 = vmatprep.subr.bf16.mxu1 %v4568_v33  ;;  %v4640_v33 = vld [vmem:[#allocation8 + $0x224] ss:$24 sps:$4 sm:$0xff]  }
 0x501   :  { %2906 = vmatpush1.bf16.msra.mxu0 %v4563_v34  ;;  %v4638_v34 = vld [vmem:[#allocation8 + $0x220] ss:$24 sps:$4 sm:$0xff]  }
 0x502   :  { %3029 = vmatpush1.bf16.msra.mxu1 %v4566_v36  ;;  %2907 = vmatprep.subr.bf16.mxu0 %v4571_v37  ;;  %v4643_v36 = vld [vmem:[#allocation8 + $0x254] ss:$24 sps:$4 sm:$0xff]   ;;  %v4641_v37 = vld [vmem:[#allocation8 + $0x250] ss:$24 sps:$4 sm:$0xff]  }
 0x503   :  { %3030 = vmatprep.subr.bf16.mxu1 %v4574_v38  ;;  %v4646_v38 = vld [vmem:[#allocation8 + $0x284] ss:$24 sps:$4 sm:$0xff]  }
 0x505   :  { %2908 = vmatpush1.bf16.msra.mxu0 %v4569_v39  ;;  %v4644_v39 = vld [vmem:[#allocation8 + $0x280] ss:$24 sps:$4 sm:$0xff]  }
 0x506   :  { %3031 = vmatpush1.bf16.msra.mxu1 %v4572_v40  ;;  %2909 = vmatprep.subr.bf16.mxu0 %v4577_v42  ;;  %v4649_v40 = vld [vmem:[#allocation8 + $0x2b4] ss:$24 sps:$4 sm:$0xff]   ;;  %v4647_v42 = vld [vmem:[#allocation8 + $0x2b0] ss:$24 sps:$4 sm:$0xff]  }
 0x507   :  { %3032 = vmatprep.subr.bf16.mxu1 %v4580_v43  ;;  %v4652_v43 = vld [vmem:[#allocation8 + $0x2e4] ss:$24 sps:$4 sm:$0xff]  }
 0x509   :  { %2910 = vmatpush1.bf16.msra.mxu0 %v4575_v44  ;;  %v4650_v44 = vld [vmem:[#allocation8 + $0x2e0] ss:$24 sps:$4 sm:$0xff]  }
 0x50a   :  { %3033 = vmatpush1.bf16.msra.mxu1 %v4578_v45  ;;  %2911 = vmatprep.subr.bf16.mxu0 %v4583_v46  ;;  %v4746_v45 = vld [vmem:[%s5391_s5 + $0x40] sm:$0xff]  }
 0x50b   :  { %3034 = vmatprep.subr.bf16.mxu1 %v4586_v47  ;;  %v4655_v46 = vld [vmem:[#allocation8 + $0x314] ss:$24 sps:$4 sm:$0xff]  }
 0x50c   :  { %v4750_v47 = vld [vmem:[%s5391_s5] sm:$0xff]  }
 0x50d   :  { %2912 = vmatpush1.bf16.msra.mxu0 %v4581_v48  ;;  %v4653_v48 = vld [vmem:[#allocation8 + $0x310] ss:$24 sps:$4 sm:$0xff]  }
 0x50e   :  { %3035 = vmatpush1.bf16.msra.mxu1 %v4584_v51  ;;  %2913 = vmatprep.subr.bf16.mxu0 %v4589_v52  ;;  %v4751_v51 = vld [vmem:[%s5391_s5 + $0x48] sm:$0xff]   ;;  %v4658_v52 = vld [vmem:[#allocation8 + $0x344] ss:$24 sps:$4 sm:$0xff]  }
 0x50f   :  { %3036 = vmatprep.subr.bf16.mxu1 %v4592_v49  ;;  %v4752_v49 = vld [vmem:[%s5391_s5 + $0x8] sm:$0xff]  }
 0x511   :  { %2914 = vmatpush1.bf16.msra.mxu0 %v4587_v55  ;;  %v4753_v55 = vld [vmem:[%s5391_s5 + $0x50] sm:$0xff]  }
 0x512   :  { %3037 = vmatpush1.bf16.msra.mxu1 %v4590_v57  ;;  %2915 = vmatprep.subr.bf16.mxu0 %v4595_v58  ;;  %v4661_v57 = vld [vmem:[#allocation8 + $0x374] ss:$24 sps:$4 sm:$0xff]  }
 0x513   :  { %3038 = vmatprep.subr.bf16.mxu1 %v4598_v60  ;;  %v4754_v58 = vld [vmem:[%s5391_s5 + $0x10] sm:$0xff]   ;;  %v4659_v60 = vld [vmem:[#allocation8 + $0x370] ss:$24 sps:$4 sm:$0xff]  }
 0x515   :  { %2916 = vmatpush1.bf16.msra.mxu0 %v4593_v61  ;;  %v4664_v61 = vld [vmem:[#allocation8 + $0x3a4] ss:$24 sps:$4 sm:$0xff]  }
 0x516   :  { %3039 = vmatpush1.bf16.msra.mxu1 %v4596_v35  ;;  %2917 = vmatprep.subr.bf16.mxu0 %v4601_v62  ;;  %v4662_v35 = vld [vmem:[#allocation8 + $0x3a0] ss:$24 sps:$4 sm:$0xff]   ;;  %v4667_v62 = vld [vmem:[#allocation8 + $0x3d4] ss:$24 sps:$4 sm:$0xff]  }
 0x517   :  { %3040 = vmatprep.subr.bf16.mxu1 %v4604_v0  ;;  %v4758_v0 = vld [vmem:[%s5391_s5 + $0x20] sm:$0xff]  }
 0x519   :  { %2918 = vmatpush1.bf16.msra.mxu0 %v4599_v1  ;;  %v4759_v1 = vld [vmem:[%s5391_s5 + $0x68] sm:$0xff]  }
 0x51a   :  { %3041 = vmatpush1.bf16.msra.mxu1 %v4602_v8  ;;  %3051 = vmatprep.subr.bf16.mxu0 %v4607_v3  ;;  %v4670_v8 = vld [vmem:[#allocation8 + $0x404] ss:$24 sps:$4 sm:$0xff]   ;;  %v4760_v3 = vld [vmem:[%s5391_s5 + $0x28] sm:$0xff]  }
 0x51b   :  { %4109 = vmatprep.subr.bf16.mxu1 %v4746_v45  ;;  %v4707_v45 = vld [vmem:[#allocation8 + $0x670] ss:$24 sps:$4 sm:$0xff]  }
 0x51c   :  { %2920 = vmatmul.mubr.bf16.vlgmr.msra.gmra.mrb[4].mxu0 %v5200_v5 }
 0x51d   :  { %3043 = vmatmul.mubr.bf16.vlgmr.msra.gmra.mrb[20].mxu1 %v5200_v5  ;;  %3052 = vmatpush1.bf16.msra.mxu0 %v4605_v4  ;;  %v4668_v4 = vld [vmem:[#allocation8 + $0x400] ss:$24 sps:$4 sm:$0xff]  }
 0x51e   :  { %3083 = vmatprep.mubr.bf16.mxu0 %v5158_v21  ;;  %3053 = vmatprep.subr.bf16.mxu0 %v4610_v27  ;;  %v4623_v21 = vld [vmem:[#allocation8 + $0x130] ss:$24 sps:$4 sm:$0xff]   ;;  %v4673_v27 = vld [vmem:[#allocation8 + $0x434] ss:$24 sps:$4 sm:$0xff]  }
 0x51f   :  { %4110 = vmatpush3.bf16.msra.mxu1 %v4750_v47  ;;  %v4710_v47 = vld [vmem:[#allocation8 + $0x6a0] ss:$24 sps:$4 sm:$0xff]  }
 0x520   :  { %4111 = vmatprep.subr.bf16.mxu1 %v4751_v51  ;;  %v4713_v51 = vld [vmem:[#allocation8 + $0x6d0] ss:$24 sps:$4 sm:$0xff]  }
 0x521   :  { %3054 = vmatpush1.bf16.msra.mxu0 %v4608_v10  ;;  %v4761_v10 = vld [vmem:[%s5391_s5 + $0x70] sm:$0xff]  }
 0x522   :  { %3055 = vmatprep.subr.bf16.mxu0 %v4613_v11  ;;  %v4762_v11 = vld [vmem:[%s5391_s5 + $0x30] sm:$0xff]  }
 0x523   :  { %4112 = vmatpush3.bf16.msra.mxu1 %v4752_v49  ;;  %v4721_v49 = vld [vmem:[#allocation8 + $0x734] ss:$24 sps:$4 sm:$0xff]  }
 0x524   :  { %4113 = vmatprep.subr.bf16.mxu1 %v4753_v55  ;;  %v4724_v55 = vld [vmem:[#allocation8 + $0x764] ss:$24 sps:$4 sm:$0xff]  }
 0x525   :  { %3056 = vmatpush1.bf16.msra.mxu0 %v4611_v12  ;;  %v4671_v12 = vld [vmem:[#allocation8 + $0x430] ss:$24 sps:$4 sm:$0xff]  }
 0x526   :  { %3057 = vmatprep.subr.bf16.mxu0 %v4616_v13  ;;  %v4676_v13 = vld [vmem:[#allocation8 + $0x464] ss:$24 sps:$4 sm:$0xff]  }
 0x527   :  { %4114 = vmatpush3.bf16.msra.mxu1 %v4754_v58  ;;  %v4725_v58 = vld [vmem:[#allocation8 + $0x790] ss:$24 sps:$4 sm:$0xff]  }
 0x529   :  { %3058 = vmatpush1.bf16.msra.mxu0 %v4614_v15  ;;  %v4763_v15 = vld [vmem:[%s5391_s5 + $0x78] sm:$0xff]  }
 0x52a   :  { %3059 = vmatprep.subr.bf16.mxu0 %v4619_v16  ;;  %v4764_v16 = vld [vmem:[%s5391_s5 + $0x38] sm:$0xff]  }
 0x52d   :  { %3060 = vmatpush1.bf16.msra.mxu0 %v4617_v17  ;;  %v4674_v17 = vld [vmem:[#allocation8 + $0x460] ss:$24 sps:$4 sm:$0xff]  }
 0x52e   :  { %3061 = vmatprep.subr.bf16.mxu0 %v4622_v18  ;;  %v4679_v18 = vld [vmem:[#allocation8 + $0x494] ss:$24 sps:$4 sm:$0xff]  }
 0x531   :  { %3062 = vmatpush1.bf16.msra.mxu0 %v4620_v19  ;;  %v4765_v19 = vld [vmem:[%s5391_s5 + $0xc0] sm:$0xff]  }
 0x532   :  { %3063 = vmatprep.subr.bf16.mxu0 %v4625_v20  ;;  %v4677_v20 = vld [vmem:[#allocation8 + $0x490] ss:$24 sps:$4 sm:$0xff]  }
 0x535   :  { %3064 = vmatpush1.bf16.msra.mxu0 %v4623_v21  ;;  %v4682_v21 = vld [vmem:[#allocation8 + $0x4c4] ss:$24 sps:$4 sm:$0xff]  }
 0x536   :  { %3065 = vmatprep.subr.bf16.mxu0 %v4628_v22  ;;  %v4680_v22 = vld [vmem:[#allocation8 + $0x4c0] ss:$24 sps:$4 sm:$0xff]  }
 0x539   :  { %3066 = vmatpush1.bf16.msra.mxu0 %v4626_v25  ;;  %v4685_v25 = vld [vmem:[#allocation8 + $0x4f4] ss:$24 sps:$4 sm:$0xff]  }
 0x53a   :  { %3067 = vmatprep.subr.bf16.mxu0 %v4631_v26  ;;  %v4683_v26 = vld [vmem:[#allocation8 + $0x4f0] ss:$24 sps:$4 sm:$0xff]  }
 0x53d   :  { %3068 = vmatpush1.bf16.msra.mxu0 %v4629_v29  ;;  %v4688_v29 = vld [vmem:[#allocation8 + $0x524] ss:$24 sps:$4 sm:$0xff]  }
 0x53e   :  { %3069 = vmatprep.subr.bf16.mxu0 %v4634_v14  ;;  %v4686_v14 = vld [vmem:[#allocation8 + $0x520] ss:$24 sps:$4 sm:$0xff]  }
 0x541   :  { %3070 = vmatpush1.bf16.msra.mxu0 %v4632_v30  ;;  %v4691_v30 = vld [vmem:[#allocation8 + $0x554] ss:$24 sps:$4 sm:$0xff]  }
 0x542   :  { %3071 = vmatprep.subr.bf16.mxu0 %v4637_v31  ;;  %v4689_v31 = vld [vmem:[#allocation8 + $0x550] ss:$24 sps:$4 sm:$0xff]  }
 0x545   :  { %3072 = vmatpush1.bf16.msra.mxu0 %v4635_v32  ;;  %v4694_v32 = vld [vmem:[#allocation8 + $0x584] ss:$24 sps:$4 sm:$0xff]  }
 0x546   :  { %3073 = vmatprep.subr.bf16.mxu0 %v4640_v33  ;;  %v4692_v33 = vld [vmem:[#allocation8 + $0x580] ss:$24 sps:$4 sm:$0xff]  }
 0x549   :  { %3074 = vmatpush1.bf16.msra.mxu0 %v4638_v34  ;;  %v4697_v34 = vld [vmem:[#allocation8 + $0x5b4] ss:$24 sps:$4 sm:$0xff]  }
 0x54a   :  { %3075 = vmatprep.subr.bf16.mxu0 %v4643_v36  ;;  %v4695_v36 = vld [vmem:[#allocation8 + $0x5b0] ss:$24 sps:$4 sm:$0xff]  }
 0x54d   :  { %3076 = vmatpush1.bf16.msra.mxu0 %v4641_v37  ;;  %v4700_v37 = vld [vmem:[#allocation8 + $0x5e4] ss:$24 sps:$4 sm:$0xff]  }
 0x54e   :  { %3077 = vmatprep.subr.bf16.mxu0 %v4646_v38  ;;  %v4698_v38 = vld [vmem:[#allocation8 + $0x5e0] ss:$24 sps:$4 sm:$0xff]  }
 0x551   :  { %3078 = vmatpush1.bf16.msra.mxu0 %v4644_v39  ;;  %v4703_v39 = vld [vmem:[#allocation8 + $0x614] ss:$24 sps:$4 sm:$0xff]  }
 0x552   :  { %3079 = vmatprep.subr.bf16.mxu0 %v4649_v40  ;;  %v4701_v40 = vld [vmem:[#allocation8 + $0x610] ss:$24 sps:$4 sm:$0xff]  }
 0x555   :  { %3080 = vmatpush1.bf16.msra.mxu0 %v4647_v42  ;;  %v4706_v42 = vld [vmem:[#allocation8 + $0x644] ss:$24 sps:$4 sm:$0xff]  }
 0x556   :  { %3081 = vmatprep.subr.bf16.mxu0 %v4652_v43  ;;  %v4704_v43 = vld [vmem:[#allocation8 + $0x640] ss:$24 sps:$4 sm:$0xff]  }
 0x559   :  { %3082 = vmatpush1.bf16.msra.mxu0 %v4650_v44  ;;  %v4709_v44 = vld [vmem:[#allocation8 + $0x674] ss:$24 sps:$4 sm:$0xff]  }
 0x55a   :  { %3092 = vmatprep.subr.bf16.mxu0 %v4655_v46  ;;  %v4712_v46 = vld [vmem:[#allocation8 + $0x6a4] ss:$24 sps:$4 sm:$0xff]  }
 0x55c   :  { %3084 = vmatmul.mubr.bf16.vlgmr.msra.gmra.mrb[8].mxu0 %v5160_v24  ;;  %v4755_v24 = vld [vmem:[%s5391_s5 + $0x58] sm:$0xff]  }
 0x55d   :  { %3093 = vmatpush1.bf16.msra.mxu0 %v4653_v48  ;;  %3124 = vmatprep.mubr.bf16.mxu0 %v5172_v59  ;;  %v4756_v59 = vld [vmem:[%s5391_s5 + $0x18] sm:$0xff]   ;;  %v4715_v48 = vld [vmem:[#allocation8 + $0x6d4] ss:$24 sps:$4 sm:$0xff]  }
 0x55e   :  { %3094 = vmatprep.subr.bf16.mxu0 %v4658_v52  ;;  %4115 = vmatprep.subr.bf16.mxu1 %v4755_v24  ;;  %v4718_v52 = vld [vmem:[#allocation8 + $0x704] ss:$24 sps:$4 sm:$0xff]  }
 0x55f   :  { %4116 = vmatpush3.bf16.msra.mxu1 %v4756_v59  ;;  %v4730_v24 = vld [vmem:[#allocation8 + $0x7c4] ss:$24 sps:$4 sm:$0xff]   ;;  %v4731_v59 = vld [vmem:[#allocation8 + $0x7f0] ss:$24 sps:$4 sm:$0xff]  }
 0x560   :  { %4117 = vmatprep.subr.bf16.mxu1 %v4757_v63  ;;  %v4736_v63 = vld [vmem:[#allocation8 + $0x824] ss:$24 sps:$4 sm:$0xff]  }
 0x561   :  { %3095 = vmatpush1.bf16.msra.mxu0 %v4656_v56  ;;  %v4722_v56 = vld [vmem:[#allocation8 + $0x760] ss:$24 sps:$4 sm:$0xff]  }
 0x562   :  { %3096 = vmatprep.subr.bf16.mxu0 %v4661_v57  ;;  %v4727_v57 = vld [vmem:[#allocation8 + $0x794] ss:$24 sps:$4 sm:$0xff]  }
 0x563   :  { %4118 = vmatpush3.bf16.msra.mxu1 %v4758_v0  ;;  %v4737_v0 = vld [vmem:[#allocation8 + $0x850] ss:$24 sps:$4 sm:$0xff]  }
 0x564   :  { %4119 = vmatprep.subr.bf16.mxu1 %v4759_v1  ;;  %v4742_v1 = vld [vmem:[#allocation8 + $0x884] ss:$24 sps:$4 sm:$0xff]  }
 0x565   :  { %3097 = vmatpush1.bf16.msra.mxu0 %v4659_v60  ;;  %v4728_v60 = vld [vmem:[#allocation8 + $0x7c0] ss:$24 sps:$4 sm:$0xff]  }
 0x566   :  { %3098 = vmatprep.subr.bf16.mxu0 %v4664_v61  ;;  %v4733_v61 = vld [vmem:[#allocation8 + $0x7f4] ss:$24 sps:$4 sm:$0xff]  }
 0x567   :  { %4120 = vmatpush3.bf16.msra.mxu1 %v4760_v3  ;;  %v4743_v3 = vld [vmem:[#allocation8 + $0x8b0] ss:$24 sps:$4 sm:$0xff]  }
 0x568   :  { %4121 = vmatprep.subr.bf16.mxu1 %v4761_v10  ;;  %v5261_v10 = vld [vmem:[#allocation10 + $0x1] ss:$4 sm:$0x3f] }
 0x569   :  { %3099 = vmatpush1.bf16.msra.mxu0 %v4662_v35  ;;  %v4734_v35 = vld [vmem:[#allocation8 + $0x820] ss:$24 sps:$4 sm:$0xff]  }
 0x56a   :  { %3100 = vmatprep.subr.bf16.mxu0 %v4667_v62  ;;  %v4739_v62 = vld [vmem:[#allocation8 + $0x854] ss:$24 sps:$4 sm:$0xff]  }
 0x56b   :  { %4122 = vmatpush3.bf16.msra.mxu1 %v4762_v11  ;;  %v1338_v11 = vrot.slane %v5261_v10, %v665_v7 }
 0x56c   :  { %4123 = vmatprep.subr.bf16.mxu1 %v4763_v15 }
 0x56d   :  { %3101 = vmatpush1.bf16.msra.mxu0 %v4665_v2  ;;  %v4740_v2 = vld [vmem:[#allocation8 + $0x880] ss:$24 sps:$4 sm:$0xff]  }
 0x56e   :  { %3102 = vmatprep.subr.bf16.mxu0 %v4670_v8  ;;  %v4745_v8 = vld [vmem:[#allocation8 + $0x8b4] ss:$24 sps:$4 sm:$0xff]  }
 0x56f   :  { %4124 = vmatpush3.bf16.msra.mxu1 %v4764_v16 }
 0x570   :  { %4131 = vmatprep.subr.bf16.mxu1 %v4765_v19 }
 0x571   :  { %3103 = vmatpush1.bf16.msra.mxu0 %v4668_v4  ;;  %v4749_v4 = vld [vmem:[#allocation8 + $0x8e4] ss:$24 sps:$4 sm:$0xff]  }
 0x572   :  { %3104 = vmatprep.subr.bf16.mxu0 %v4673_v27  ;;  %v4747_v27 = vld [vmem:[#allocation8 + $0x8e0] ss:$24 sps:$4 sm:$0xff]  }
 0x575   :  { %3105 = vmatpush1.bf16.msra.mxu0 %v4671_v12  ;;  %v1342_v12 = vrot.slane %v5261_v10, %v669_v9  ;;  %v4766_v9 = vld [vmem:[%s5391_s5 + $0x80] sm:$0xff]  }
 0x576   :  { %3106 = vmatprep.subr.bf16.mxu0 %v4676_v13  ;;  %v1350_v13 = vrot.slane %v5261_v10, %v677_v41 }
 0x579   :  { %3107 = vmatpush1.bf16.msra.mxu0 %v4674_v17 }
 0x57a   :  { %3108 = vmatprep.subr.bf16.mxu0 %v4679_v18 }
 0x57d   :  { %3109 = vmatpush1.bf16.msra.mxu0 %v4677_v20 }
 0x57e   :  { %3110 = vmatprep.subr.bf16.mxu0 %v4682_v21 }
 0x581   :  { %3111 = vmatpush1.bf16.msra.mxu0 %v4680_v22 }
 0x582   :  { %3112 = vmatprep.subr.bf16.mxu0 %v4685_v25 }
 0x585   :  { %3113 = vmatpush1.bf16.msra.mxu0 %v4683_v26 }
 0x586   :  { %3114 = vmatprep.subr.bf16.mxu0 %v4688_v29 }
 0x589   :  { %3115 = vmatpush1.bf16.msra.mxu0 %v4686_v14 }
 0x58a   :  { %3116 = vmatprep.subr.bf16.mxu0 %v4691_v30 }
 0x58d   :  { %3117 = vmatpush1.bf16.msra.mxu0 %v4689_v31  ;;  %v4767_v31 = vld [vmem:[%s5391_s5 + $0xc8] sm:$0xff]  }
 0x58e   :  { %3118 = vmatprep.subr.bf16.mxu0 %v4694_v32 }
 0x591   :  { %3119 = vmatpush1.bf16.msra.mxu0 %v4692_v33  ;;  %v4768_v33 = vld [vmem:[%s5391_s5 + $0x88] sm:$0xff]  }
 0x592   :  { %3120 = vmatprep.subr.bf16.mxu0 %v4697_v34  ;;  %v4769_v34 = vld [vmem:[%s5391_s5 + $0xd0] sm:$0xff]  }
 0x595   :  { %3121 = vmatpush1.bf16.msra.mxu0 %v4695_v36  ;;  %v4770_v36 = vld [vmem:[%s5391_s5 + $0x90] sm:$0xff]  }
 0x596   :  { %3122 = vmatprep.subr.bf16.mxu0 %v4700_v37  ;;  %v4771_v37 = vld [vmem:[%s5391_s5 + $0xd8] sm:$0xff]  }
 0x599   :  { %3123 = vmatpush1.bf16.msra.mxu0 %v4698_v38  ;;  %v4772_v38 = vld [vmem:[%s5391_s5 + $0x98] sm:$0xff]  }
 0x59a   :  { %3133 = vmatprep.subr.bf16.mxu0 %v4703_v39  ;;  %v4773_v39 = vld [vmem:[%s5391_s5 + $0xe0] sm:$0xff]  }
 0x59c   :  { %3125 = vmatmul.mubr.bf16.vlgmr.msra.gmra.mrb[8].mxu0 %v5187_v53  ;;  %v4716_v53 = vld [vmem:[#allocation8 + $0x700] ss:$24 sps:$4 sm:$0xff]  }
 0x59d   :  { %3134 = vmatpush1.bf16.msra.mxu0 %v4701_v40  ;;  %3165 = vmatprep.mubr.bf16.mxu0 %v5189_v54  ;;  %v4719_v54 = vld [vmem:[#allocation8 + $0x730] ss:$24 sps:$4 sm:$0xff]  }
 0x59e   :  { %3135 = vmatprep.subr.bf16.mxu0 %v4706_v42  ;;  %v4774_v40 = vld [vmem:[%s5391_s5 + $0xa0] sm:$0xff]   ;;  %v4775_v42 = vld [vmem:[%s5391_s5 + $0xe8] sm:$0xff]  }
 0x5a1   :  { %3136 = vmatpush1.bf16.msra.mxu0 %v4704_v43  ;;  %v4776_v43 = vld [vmem:[%s5391_s5 + $0xa8] sm:$0xff]  }
 0x5a2   :  { %3137 = vmatprep.subr.bf16.mxu0 %v4709_v44  ;;  %v1346_v44 = vrot.slane %v5261_v10, %v673_v23  ;;  %v4780_v23 = vld [vmem:[%s5391_s5 + $0xb8] sm:$0xff]  }
 0x5a5   :  { %3138 = vmatpush1.bf16.msra.mxu0 %v4707_v45  ;;  %v4777_v45 = vld [vmem:[%s5391_s5 + $0xf0] sm:$0xff]  }
 0x5a6   :  { %3139 = vmatprep.subr.bf16.mxu0 %v4712_v46  ;;  %v4778_v46 = vld [vmem:[%s5391_s5 + $0xb0] sm:$0xff]  }
 0x5a9   :  { %3140 = vmatpush1.bf16.msra.mxu0 %v4710_v47 }
 0x5aa   :  { %3141 = vmatprep.subr.bf16.mxu0 %v4715_v48  ;;  %v4779_v48 = vld [vmem:[%s5391_s5 + $0xf8] sm:$0xff]  }
 0x5ad   :  { %3142 = vmatpush1.bf16.msra.mxu0 %v4713_v51 }
 0x5ae   :  { %3143 = vmatprep.subr.bf16.mxu0 %v4718_v52  ;;  %v4781_v52 = vld [vmem:[%s5391_s5 + $0x140] sm:$0xff]  }
 0x5b1   :  { %3144 = vmatpush1.bf16.msra.mxu0 %v4716_v53  ;;  %v4782_v53 = vld [vmem:[%s5391_s5 + $0x100] sm:$0xff]  }
 0x5b2   :  { %3145 = vmatprep.subr.bf16.mxu0 %v4721_v49 }
 0x5b5   :  { %3146 = vmatpush1.bf16.msra.mxu0 %v4719_v54  ;;  %v4783_v54 = vld [vmem:[%s5391_s5 + $0x148] sm:$0xff]  }
 0x5b6   :  { %3147 = vmatprep.subr.bf16.mxu0 %v4724_v55  ;;  %v4784_v55 = vld [vmem:[%s5391_s5 + $0x108] sm:$0xff]  }
 0x5b9   :  { %3148 = vmatpush1.bf16.msra.mxu0 %v4722_v56  ;;  %v4785_v56 = vld [vmem:[%s5391_s5 + $0x150] sm:$0xff]  }
 0x5ba   :  { %3149 = vmatprep.subr.bf16.mxu0 %v4727_v57  ;;  %v4786_v57 = vld [vmem:[%s5391_s5 + $0x110] sm:$0xff]  }
 0x5bd   :  { %3150 = vmatpush1.bf16.msra.mxu0 %v4725_v58  ;;  %v4787_v58 = vld [vmem:[%s5391_s5 + $0x158] sm:$0xff]  }
 0x5be   :  { %3151 = vmatprep.subr.bf16.mxu0 %v4730_v24  ;;  %v4788_v24 = vld [vmem:[%s5391_s5 + $0x118] sm:$0xff]  }
 0x5c1   :  { %3152 = vmatpush1.bf16.msra.mxu0 %v4728_v60  ;;  %v4789_v60 = vld [vmem:[%s5391_s5 + $0x160] sm:$0xff]  }
 0x5c2   :  { %3153 = vmatprep.subr.bf16.mxu0 %v4733_v61  ;;  %v4790_v61 = vld [vmem:[%s5391_s5 + $0x120] sm:$0xff]  }
 0x5c5   :  { %3154 = vmatpush1.bf16.msra.mxu0 %v4731_v59  ;;  %v4791_v59 = vld [vmem:[%s5391_s5 + $0x168] sm:$0xff]  }
 0x5c6   :  { %3155 = vmatprep.subr.bf16.mxu0 %v4736_v63  ;;  %v4792_v63 = vld [vmem:[%s5391_s5 + $0x128] sm:$0xff]  }
 0x5c9   :  { %3156 = vmatpush1.bf16.msra.mxu0 %v4734_v35  ;;  %v4793_v35 = vld [vmem:[%s5391_s5 + $0x170] sm:$0xff]  }
 0x5ca   :  { %3157 = vmatprep.subr.bf16.mxu0 %v4739_v62  ;;  %v4794_v62 = vld [vmem:[%s5391_s5 + $0x130] sm:$0xff]  }
 0x5cd   :  { %3158 = vmatpush1.bf16.msra.mxu0 %v4737_v0  ;;  %v4795_v0 = vld [vmem:[%s5391_s5 + $0x178] sm:$0xff]  }
 0x5ce   :  { %3159 = vmatprep.subr.bf16.mxu0 %v4742_v1  ;;  %v4796_v1 = vld [vmem:[%s5391_s5 + $0x138] sm:$0xff]   ;;  %s4972_s5 = smov [#allocation11]  }
 0x5cf   :  { %s3703_s11 = sshll.u32 %s4972_s5, 4  ;;  %s3704_s11 = int_to_ptr.vmem [resolvable:$true] %s3703_s11 }
 0x5d0   :  { %s4924_s13 = scalar_lea.vmem %s3704_s11, 32  ;;  %p4929_p13 = scmp.lt.s32.totalorder %s3704_s11, %s3704_s11 }
 0x5d1   :  { %3160 = vmatpush1.bf16.msra.mxu0 %v4740_v2  ;;  %v1354_v2 = vrot.slane %v5261_v10, %v681_v50  ;;  %p4925_p12 = scmp.ne.s32.totalorder %s3704_s11, %s4924_s13  ;;  %p4930_p0 = scmp.lt.s32.totalorder %s4924_s13, %s4924_s13 }
 0x5d2   :  { %3161 = vmatprep.subr.bf16.mxu0 %v4745_v8  ;;  %v1358_v8 = vrot.slane %v5261_v10, %v685_v28 }
 0x5d3   :  { %p4931_p1 = por %p4930_p0, %p4929_p13 }
 0x5d5   :  { %3162 = vmatpush1.bf16.msra.mxu0 %v4743_v3  ;;  %p4932_p2 = pnand %p4931_p1, %p4925_p12 }
 0x5d6   :  { %3163 = vmatprep.subr.bf16.mxu0 %v4749_v4 }
 0x5d9   :  { %3164 = vmatpush1.bf16.msra.mxu0 %v4747_v27 }
 0x5dc   :  { %3166 = vmatmul.mubr.bf16.vlgmr.msra.gmra.mrb[8].mxu0 %v5200_v5 }
 0x5ef   :  { %v2921_v15 = vpop.f32.mrb[4].mxu0 }
 0x5f0   :  { %v4208_v16 = vadd.f32 %v2921_v15, %v1338_v11  ;;  %v3044_v17 = vpop.f32.mrb[20].mxu1  ;;  %v2923_v18 = vpop.f32.mrb[5].mxu0 }
 0x5f1   :  { %v4209_v19 = vadd.f32 %v2923_v18, %v1342_v12  ;;  %v3046_v5 = vpop.f32.mrb[21].mxu1  ;;  %v2925_v20 = vpop.f32.mrb[6].mxu0  ;;  %v4210_v47 = vadd.f32 %v3044_v17, %v1346_v44 }
 0x5f2   :  { %v3174_v21 = vmax.f32 %v4208_v16, 0.0  ;;  %v4211_v22 = vadd.f32 %v3046_v5, %v1350_v13  ;;  %v3048_v25 = vpop.f32.mrb[22].mxu1  ;;  %v2926_v26 = vpop.f32.mrb[7].mxu0 }
 0x5f3   :  { %v3175_v7 = vmax.f32 %v4209_v19, 0.0  ;;  %v3049_v29 = vpop.f32.mrb[23].mxu1  ;;  %v3176_v51 = vmax.f32 %v4210_v47, 0.0 }
 0x5f4   :  { %v3177_v14 = vmax.f32 %v4211_v22, 0.0  ;;  %v3180_v41 = vpack.c.bf16 %v3174_v21, %v3174_v21 }
 0x5f5   :  { %v3181_v30 = vpack.c.bf16 %v3175_v7, %v3175_v7  ;;  %v3182_v49 = vpack.c.bf16 %v3176_v51, %v3176_v51 }
 0x5f6   :  { %v3183_v32 = vpack.c.bf16 %v3177_v14, %v3177_v14 }
 0x5f7   :  { %3607 = vmatprep.mubr.bf16.mxu1 %v3181_v30 }
 0x5f8   :  { %3608 = vmatmul.mubr.bf16.vlgmr.msra.gmra.mrb[24].mxu1 %v3180_v41 }
 0x5f9   :  { %4132 = vmatpush3.bf16.msra.mxu1 %v4766_v9  ;;  %3647 = vmatprep.mubr.bf16.mxu1 %v3183_v32 }
 0x5fa   :  { %4133 = vmatprep.subr.bf16.mxu1 %v4767_v31 }
 0x5fd   :  { %4134 = vmatpush3.bf16.msra.mxu1 %v4768_v33 }
 0x5fe   :  { %4135 = vmatprep.subr.bf16.mxu1 %v4769_v34 }
 0x601   :  { %4136 = vmatpush3.bf16.msra.mxu1 %v4770_v36 }
 0x602   :  { %4137 = vmatprep.subr.bf16.mxu1 %v4771_v37 }
 0x605   :  { %4138 = vmatpush3.bf16.msra.mxu1 %v4772_v38 }
 0x606   :  { %4139 = vmatprep.subr.bf16.mxu1 %v4773_v39 }
 0x609   :  { %4140 = vmatpush3.bf16.msra.mxu1 %v4774_v40 }
 0x60a   :  { %4141 = vmatprep.subr.bf16.mxu1 %v4775_v42 }
 0x60d   :  { %4142 = vmatpush3.bf16.msra.mxu1 %v4776_v43 }
 0x60e   :  { %4143 = vmatprep.subr.bf16.mxu1 %v4777_v45 }
 0x611   :  { %4144 = vmatpush3.bf16.msra.mxu1 %v4778_v46 }
 0x612   :  { %4145 = vmatprep.subr.bf16.mxu1 %v4779_v48 }
 0x615   :  { %4146 = vmatpush3.bf16.msra.mxu1 %v4780_v23 }
 0x616   :  { %4153 = vmatprep.subr.bf16.mxu1 %v4781_v52 }
 0x618   :  { %3648 = vmatmul.mubr.bf16.vlgmr.msra.gmra.mrb[28].mxu1 %v3182_v49 }
 0x619   :  { %4154 = vmatpush3.bf16.msra.mxu1 %v4782_v53 }
 0x61a   :  { %4155 = vmatprep.subr.bf16.mxu1 %v4783_v54 }
 0x61d   :  { %4156 = vmatpush3.bf16.msra.mxu1 %v4784_v55 }
 0x61e   :  { %4157 = vmatprep.subr.bf16.mxu1 %v4785_v56 }
 0x621   :  { %4158 = vmatpush3.bf16.msra.mxu1 %v4786_v57 }
 0x622   :  { %4159 = vmatprep.subr.bf16.mxu1 %v4787_v58 }
 0x625   :  { %4160 = vmatpush3.bf16.msra.mxu1 %v4788_v24 }
 0x626   :  { %4161 = vmatprep.subr.bf16.mxu1 %v4789_v60 }
 0x629   :  { %4162 = vmatpush3.bf16.msra.mxu1 %v4790_v61 }
 0x62a   :  { %4163 = vmatprep.subr.bf16.mxu1 %v4791_v59 }
 0x62d   :  { %4164 = vmatpush3.bf16.msra.mxu1 %v4792_v63 }
 0x62e   :  { %4165 = vmatprep.subr.bf16.mxu1 %v4793_v35 }
 0x631   :  { %4166 = vmatpush3.bf16.msra.mxu1 %v4794_v62 }
 0x632   :  { %4167 = vmatprep.subr.bf16.mxu1 %v4795_v0 }
 0x635   :  { %4168 = vmatpush3.bf16.msra.mxu1 %v4796_v1 }
 0x6af   :  { %v3167_v3 = vpop.f32.mrb[8].mxu0 }
 0x6b0   :  { %v4212_v4 = vadd.f32 %v3167_v3, %v1354_v2  ;;  %v3169_v27 = vpop.f32.mrb[9].mxu0 }
 0x6b1   :  { %v4213_v11 = vadd.f32 %v3169_v27, %v1358_v8  ;;  %v3171_v12 = vpop.f32.mrb[10].mxu0 }
 0x6b2   :  { %v3178_v13 = vmax.f32 %v4212_v4, 0.0  ;;  %v3172_v15 = vpop.f32.mrb[11].mxu0 }
 0x6b3   :  { %v3179_v16 = vmax.f32 %v4213_v11, 0.0 }
 0x6b4   :  { %v3184_v18 = vpack.c.bf16 %v3178_v13, %v3178_v13 }
 0x6b5   :  { %v3185_v17 = vpack.c.bf16 %v3179_v16, %v3179_v16 }
 0x6b7   :  { %3687 = vmatprep.mubr.bf16.mxu1 %v3185_v17 }
 0x6b8   :  { %3688 = vmatmul.mubr.bf16.vlgmr.msra.gmra.mrb[32].mxu1 %v3184_v18 }
 0x6cb   :  { %v4125_v19 = vpop.f32.mrb[24].mxu1 }
 0x6cc   :  { %v4126_v5 = vpop.f32.mrb[25].mxu1 }
 0x6cd   :  { %v4127_v20 = vadd.f32 %v4126_v5, %v4125_v19  ;;  %v4128_v50 = vpop.f32.mrb[26].mxu1 }
 0x6ce   :  { %v4129_v21 = vpop.f32.mrb[27].mxu1 }
 0x6cf   :  { %v3610_v10 = vadd.f32 %v4127_v20, %v4055_v6 }
 0x6eb   :  { %v4147_v22 = vpop.f32.mrb[28].mxu1 }
 0x6ec   :  { %v4148_v28 = vpop.f32.mrb[29].mxu1 }
 0x6ed   :  { %v4149_v25 = vadd.f32 %v4148_v28, %v4147_v22  ;;  %v4150_v26 = vpop.f32.mrb[30].mxu1 }
 0x6ee   :  { %v4151_v7 = vpop.f32.mrb[31].mxu1 }
 0x6ef   :  { %v3650_v29 = vadd.f32 %v4149_v25, %v3610_v10 }
 0x78b   :  { %v4169_v14 = vpop.f32.mrb[32].mxu1 }
 0x78c   :  { %v4170_v30 = vpop.f32.mrb[33].mxu1 }
 0x78d   :  { %v4171_v9 = vadd.f32 %v4170_v30, %v4169_v14  ;;  %v4172_v41 = vpop.f32.mrb[34].mxu1 }
 0x78e   :  { %v4173_v31 = vpop.f32.mrb[35].mxu1 }
 0x78f   :  { %v3690_v32 = vadd.f32 %v4171_v9, %v3650_v29 }
 0x791   :  { %3696 = vst.msk [vmem:[#allocation11] sm:$0x3] %vm3695_vm14, %v3690_v32 }
 0x792   :  { %4935 = shalt.err (!%p4932_p2)
}
 0x793   :  { %s4936_s4 = scalar_lea.hbm %s5393_s7, 32 }
 0x794   :  { %p4937_p3 = scmp.ne.s32.totalorder %s5393_s7, %s4936_s4  ;;  %p4940_p4 = scmp.lt.u32.totalorder %s4936_s4, %s5393_s7 }
 0x796   :  { %p4942_p5 = pnand %p4940_p4, %p4937_p3 }
 0x798   :  { %4945 = shalt.err (!%p4942_p5)
}
 0x799   :  { %3706 = dma.vmem_to_hbm [thread:$0]  %s3704_s11, 32, %s5393_s7, [#allocation4]  }
 0x79a   :  { %4952 = dma.done.wait [#allocation4], 32  }
 0x79b   :  { %4953 = vsyncadd [#allocation4], 4294967264 }
 0x79c   :  { %3710 = vsyncpa [#allocation3], 1 }
 0x79d   :  { %3711 = vsyncpa [#allocation6], 1 }
 0x79e   :  { %3712 = vsyncpa [#allocation9], 1 }
 0x79f   :  { %3713 = vsyncpa [#allocation4], 1 }

</bundles_post_ra>
